<compile_context>
chip_gen: v5e
topology: v5e:2x2
jax: 0.10.0
libtpu: 0.0.40
codegen_flags: <defaults>
</compile_context>

<pallas_src>
import functools
import math

import jax
import jax.numpy as jnp
from jax import lax
from jax.experimental import pallas as pl
from jax.experimental.pallas import tpu as pltpu

LN_EPS = 1e-5                    # torch nn.LayerNorm default
NEG_INF = -1e30                  # finite mask sentinel (no NaN on masked rows)


def _detect_vmem_limit():
    """Generation-aware scoped-VMEM limit (~0.75 x physical, conservative cap)."""
    try:
        cap = getattr(pltpu.get_tpu_info(), "vmem_capacity_bytes", None)
        if cap:
            return min(int(0.75 * cap), 100 * 1024 * 1024)
    except Exception:
        pass
    return 48 * 1024 * 1024      # safe fallback (fits v7x's 64 MiB per-TC VMEM)


VMEM_LIMIT = _detect_vmem_limit()


# ----------------------------- in-kernel helpers -----------------------------
def _layer_norm(x, w, b):
    mu = jnp.mean(x, axis=-1, keepdims=True)
    var = jnp.mean(jnp.square(x - mu), axis=-1, keepdims=True)
    return (x - mu) * lax.rsqrt(var + LN_EPS) * w + b


def _gelu_exact(x):
    # torch nn.GELU default = exact (erf) form
    return 0.5 * x * (1.0 + lax.erf(x * 0.7071067811865476))


def _bf16(x):
    return x.astype(jnp.bfloat16)


# ------------------------------- Pallas kernels -------------------------------
def qkv_attn_kernel(x_ref, ln1w_ref, ln1b_ref, wqkv_ref, bqkv_ref,
                    cos_ref, sin_ref, o_ref, *, num_heads, scale):
    """Per-batch block: LN1 -> fused QKV -> per-head RoPE + causal attention.

    q/k/v stay in VMEM/vregs (no HBM round trip, no head transposes); output is
    written back in (T, D) layout with a single lane-dense store.
    """
    x = x_ref[0]                                          # (T, D) f32
    t, d_model = x.shape
    hd = d_model // num_heads
    half = hd // 2

    xn = _layer_norm(x, ln1w_ref[...], ln1b_ref[...])
    qkv = jnp.dot(_bf16(xn), wqkv_ref[...],
                  preferred_element_type=jnp.float32) + bqkv_ref[...]   # (T, 3D) f32

    cos = cos_ref[...]                                    # (T, hd/2) f32
    sin = sin_ref[...]

    # Causal mask from iota (no (T,T) HBM stream, finite sentinel -> no NaN).
    row = lax.broadcasted_iota(jnp.int32, (t, t), 0)
    col = lax.broadcasted_iota(jnp.int32, (t, t), 1)
    causal = col <= row

    outs = []
    for h in range(num_heads):                            # static unroll over heads
        q = qkv[:, h * hd:(h + 1) * hd]
        k = qkv[:, d_model + h * hd:d_model + (h + 1) * hd]
        v = qkv[:, 2 * d_model + h * hd:2 * d_model + (h + 1) * hd]

        # RoPE in f32, exact: rotate-half via half-width slices (VPU/XLU work,
        # no extra MXU pass, no (D,D) rotation weight resident in VMEM).
        q1, q2 = q[:, :half], q[:, half:]
        k1, k2 = k[:, :half], k[:, half:]
        q = jnp.concatenate([q1 * cos - q2 * sin, q2 * cos + q1 * sin], axis=-1)
        k = jnp.concatenate([k1 * cos - k2 * sin, k2 * cos + k1 * sin], axis=-1)

        s = lax.dot_general(_bf16(q), _bf16(k), (((1,), (1,)), ((), ())),
                            preferred_element_type=jnp.float32) * scale  # (T, T)
        s = jnp.where(causal, s, NEG_INF)
        m = jnp.max(s, axis=-1, keepdims=True)
        p = jnp.exp(s - m)
        # approx reciprocal (EUP) is fine for eval; switch to exact if logits
        # feed a loss/gradient path.
        inv = pl.reciprocal(jnp.sum(p, axis=-1, keepdims=True), approx=True)
        o = jnp.dot(_bf16(p * inv), _bf16(v), preferred_element_type=jnp.float32)
        outs.append(o.astype(o_ref.dtype))

    o_ref[0] = jnp.concatenate(outs, axis=-1)             # one lane-dense (T, D) store


def proj_ffn_kernel(x_ref, attn_ref, wo_ref, bo_ref, ln2w_ref, ln2b_ref,
                    w1_ref, b1_ref, w2_ref, b2_ref, out_ref):
    """Row tile: x += Wo(attn); x += FFN(LN2(x)).  x aliased in/out."""
    x = x_ref[...]                                        # (tile, D) f32 residual
    attn_out = jnp.dot(attn_ref[...], wo_ref[...],
                       preferred_element_type=jnp.float32) + bo_ref[...]
    x = x + attn_out
    xn = _layer_norm(x, ln2w_ref[...], ln2b_ref[...])
    h1 = jnp.dot(_bf16(xn), w1_ref[...], preferred_element_type=jnp.float32) + b1_ref[...]
    h1 = _gelu_exact(h1)
    y = jnp.dot(_bf16(h1), w2_ref[...], preferred_element_type=jnp.float32) + b2_ref[...]
    out_ref[...] = x + y


def head_kernel(x_ref, lnw_ref, lnb_ref, w_ref, b_ref, out_ref):
    """Row tile: final LayerNorm + lane-padded classifier projection."""
    xn = _layer_norm(x_ref[...], lnw_ref[...], lnb_ref[...])
    out_ref[...] = jnp.dot(_bf16(xn), w_ref[...],
                           preferred_element_type=jnp.float32) + b_ref[...]


# ------------------------------ pallas_call glue ------------------------------
def _full_spec(shape):
    nd = len(shape)
    return pl.BlockSpec(shape, lambda *_: (0,) * nd)


def _pick_row_tile(n_rows, target=512):
    """Largest multiple-of-8 divisor of n_rows that still yields >=2 grid steps."""
    cap = min(target, max(8, n_rows // 2))
    best = 0
    for t in range(8, cap + 1, 8):
        if n_rows % t == 0:
            best = t
    return best if best else n_rows


def _nbytes(arrs):
    return sum(int(a.size) * a.dtype.itemsize for a in arrs)


def fused_qkv_attention(x2, lp, cos, sin, batch, seq_len, num_heads):
    rows, d_model = x2.shape
    head_dim = d_model // num_heads
    x3 = x2.reshape(batch, seq_len, d_model)              # free metadata reshape
    weights = (lp['ln1_w'], lp['ln1_b'], lp['wqkv'], lp['bqkv'], cos, sin)
    flops = (2 * rows * d_model * 3 * d_model
             + 2 * 2 * batch * num_heads * seq_len * seq_len * head_dim)
    cost = pl.CostEstimate(
        flops=int(flops),
        transcendentals=int(batch * num_heads * seq_len * seq_len),
        bytes_accessed=int(_nbytes((x3,) + weights) + rows * d_model * 2))
    blk = pl.BlockSpec((1, seq_len, d_model), lambda b: (b, 0, 0))
    out = pl.pallas_call(
        functools.partial(qkv_attn_kernel, num_heads=num_heads,
                          scale=1.0 / math.sqrt(head_dim)),
        grid=(batch,),
        in_specs=[blk] + [_full_spec(w.shape) for w in weights],
        out_specs=blk,
        out_shape=jax.ShapeDtypeStruct((batch, seq_len, d_model), jnp.bfloat16),
        compiler_params=pltpu.CompilerParams(
            dimension_semantics=("parallel",), vmem_limit_bytes=VMEM_LIMIT),
        cost_estimate=cost,
    )(x3, *weights)
    return out.reshape(rows, d_model)


def proj_ffn(x2, attn2, lp, row_tile):
    rows, d_model = x2.shape
    f_dim = lp['w1'].shape[1]
    weights = (lp['wo'], lp['bo'], lp['ln2_w'], lp['ln2_b'],
               lp['w1'], lp['b1'], lp['w2'], lp['b2'])
    flops = 2 * rows * d_model * d_model + 2 * 2 * rows * d_model * f_dim
    cost = pl.CostEstimate(flops=int(flops), transcendentals=int(rows * f_dim),
                           bytes_accessed=int(_nbytes((x2, attn2) + weights)
                                              + x2.size * 4))
    row_spec = pl.BlockSpec((row_tile, d_model), lambda i: (i, 0))
    return pl.pallas_call(
        proj_ffn_kernel,
        grid=(rows // row_tile,),
        in_specs=[row_spec, row_spec] + [_full_spec(w.shape) for w in weights],
        out_specs=row_spec,
        out_shape=jax.ShapeDtypeStruct(x2.shape, x2.dtype),
        input_output_aliases={0: 0},          # residual stream updated in place
        compiler_params=pltpu.CompilerParams(
            dimension_semantics=("parallel",), vmem_limit_bytes=VMEM_LIMIT),
        cost_estimate=cost,
    )(x2, attn2, *weights)


def final_head(x2, packed, row_tile):
    rows, d_model = x2.shape
    n_pad = packed['w_out'].shape[1]          # lane-padded to a multiple of 128
    weights = (packed['lnf_w'], packed['lnf_b'], packed['w_out'], packed['b_out'])
    cost = pl.CostEstimate(flops=int(2 * rows * d_model * n_pad), transcendentals=0,
                           bytes_accessed=int(_nbytes((x2,) + weights)
                                              + rows * n_pad * 4))
    return pl.pallas_call(
        head_kernel,
        grid=(rows // row_tile,),
        in_specs=[pl.BlockSpec((row_tile, d_model), lambda i: (i, 0))]
                 + [_full_spec(w.shape) for w in weights],
        out_specs=pl.BlockSpec((row_tile, n_pad), lambda i: (i, 0)),
        out_shape=jax.ShapeDtypeStruct((rows, n_pad), x2.dtype),
        compiler_params=pltpu.CompilerParams(
            dimension_semantics=("parallel",), vmem_limit_bytes=VMEM_LIMIT),
        cost_estimate=cost,
    )(x2, *weights)


# ------------------------------- model plumbing -------------------------------
def rope_tables(seq_len, head_dim, base=10000.0):
    half = head_dim // 2
    inv_freq = 1.0 / (base ** (jnp.arange(half, dtype=jnp.float32) / half))
    theta = jnp.arange(seq_len, dtype=jnp.float32)[:, None] * inv_freq[None, :]
    return jnp.cos(theta), jnp.sin(theta)          # each (T, half) — tiny, stays f32


def pack_params(params, num_heads):
    """Fuse QKV, pre-cast matmul weights to bf16, lane-pad the classifier."""
    d_model = params['embedding'].shape[1]
    packed = {'embedding': params['embedding']}
    layers = []
    for lp in params['layers']:
        layers.append({
            'ln1_w': lp['ln1_w'], 'ln1_b': lp['ln1_b'],
            'wqkv': jnp.concatenate([lp['wq'], lp['wk'], lp['wv']],
                                    axis=1).astype(jnp.bfloat16),
            'bqkv': jnp.concatenate([lp['bq'], lp['bk'], lp['bv']], axis=1),
            'wo': lp['wo'].astype(jnp.bfloat16), 'bo': lp['bo'],
            'ln2_w': lp['ln2_w'], 'ln2_b': lp['ln2_b'],
            'w1': lp['w1'].astype(jnp.bfloat16), 'b1': lp['b1'],
            'w2': lp['w2'].astype(jnp.bfloat16), 'b2': lp['b2'],
        })
    packed['layers'] = layers
    packed['lnf_w'] = params['lnf_w']
    packed['lnf_b'] = params['lnf_b']
    label_dim = params['w_out'].shape[1]
    n_pad = ((label_dim + 127) // 128) * 128
    w_out = jnp.zeros((d_model, n_pad), jnp.float32).at[:, :label_dim].set(params['w_out'])
    b_out = jnp.zeros((1, n_pad), jnp.float32).at[:, :label_dim].set(params['b_out'])
    packed['w_out'] = w_out.astype(jnp.bfloat16)
    packed['b_out'] = b_out
    return packed, label_dim


def causal_transformer_forward(tokens, packed, num_heads, label_dim):
    B, T = tokens.shape
    d_model = packed['embedding'].shape[1]
    hd = d_model // num_heads
    x2 = jnp.take(packed['embedding'], tokens, axis=0).reshape(B * T, d_model)  # glue
    cos, sin = rope_tables(T, hd)                     # (T, hd/2) each
    row_tile = _pick_row_tile(B * T)

    for lp in packed['layers']:
        attn2 = fused_qkv_attention(x2, lp, cos, sin, B, T, num_heads)  # (B*T, D) bf16
        x2 = proj_ffn(x2, attn2, lp, row_tile)

    logits = final_head(x2, packed, row_tile)
    return logits[:, :label_dim].reshape(B, T, label_dim)


# --------------------------- pure-JAX reference check --------------------------
def reference_forward(tokens, params, num_heads):
    B, T = tokens.shape
    x = jnp.take(params['embedding'], tokens, axis=0)
    d_model = x.shape[-1]
    hd = d_model // num_heads
    half = hd // 2
    cos, sin = rope_tables(T, hd)
    tri = jnp.triu(jnp.ones((T, T), dtype=bool), k=1)
    mask = jnp.where(tri, jnp.float32(-jnp.inf), jnp.float32(0.0))

    def ln(z, w, b):
        mu = jnp.mean(z, -1, keepdims=True)
        var = jnp.mean(jnp.square(z - mu), -1, keepdims=True)
        return (z - mu) / jnp.sqrt(var + LN_EPS) * w + b

    for lp in params['layers']:
        xn = ln(x, lp['ln1_w'], lp['ln1_b'])
        q = (xn @ lp['wq'] + lp['bq']).reshape(B, T, num_heads, hd).transpose(0, 2, 1, 3)
        k = (xn @ lp['wk'] + lp['bk']).reshape(B, T, num_heads, hd).transpose(0, 2, 1, 3)
        v = (xn @ lp['wv'] + lp['bv']).reshape(B, T, num_heads, hd).transpose(0, 2, 1, 3)
        q1, q2 = q[..., :half], q[..., half:]
        k1, k2 = k[..., :half], k[..., half:]
        q = jnp.concatenate([q1 * cos - q2 * sin, q2 * cos + q1 * sin], -1)
        k = jnp.concatenate([k1 * cos - k2 * sin, k2 * cos + k1 * sin], -1)
        scores = jnp.einsum('bhqd,bhkd->bhqk', q, k) / math.sqrt(hd) + mask
        w = jax.nn.softmax(scores, axis=-1)
        attn = jnp.einsum('bhqk,bhkd->bhqd', w, v).transpose(0, 2, 1, 3).reshape(B, T, d_model)
        x = x + (attn @ lp['wo'] + lp['bo'])
        xn2 = ln(x, lp['ln2_w'], lp['ln2_b'])
        h1 = jax.nn.gelu(xn2 @ lp['w1'] + lp['b1'], approximate=False)
        x = x + (h1 @ lp['w2'] + lp['b2'])
    x = ln(x, params['lnf_w'], params['lnf_b'])
    return x @ params['w_out'] + params['b_out']


# ---------------------------------- init -------------------------------------
def init_params(key, num_blocks, data_dim, model_dim, label_dim, num_heads, ff_hidden_dim):
    keys = iter(jax.random.split(key, 8 + 16 * num_blocks))

    def linear(in_d, out_d):
        bound = 1.0 / math.sqrt(in_d)
        w = jax.random.uniform(next(keys), (in_d, out_d), jnp.float32, -bound, bound)
        b = jax.random.uniform(next(keys), (1, out_d), jnp.float32, -bound, bound)
        return w, b

    def ln_params(d):
        w = 1.0 + 0.1 * jax.random.normal(next(keys), (1, d), jnp.float32)
        b = 0.1 * jax.random.normal(next(keys), (1, d), jnp.float32)
        return w, b

    params = {'embedding': jax.random.normal(next(keys), (data_dim, model_dim), jnp.float32)}
    layers = []
    for _ in range(num_blocks):
        lp = {}
        lp['ln1_w'], lp['ln1_b'] = ln_params(model_dim)
        lp['wq'], lp['bq'] = linear(model_dim, model_dim)
        lp['wk'], lp['bk'] = linear(model_dim, model_dim)
        lp['wv'], lp['bv'] = linear(model_dim, model_dim)
        lp['wo'], lp['bo'] = linear(model_dim, model_dim)
        lp['ln2_w'], lp['ln2_b'] = ln_params(model_dim)
        lp['w1'], lp['b1'] = linear(model_dim, ff_hidden_dim)
        lp['w2'], lp['b2'] = linear(ff_hidden_dim, model_dim)
        layers.append(lp)
    params['layers'] = layers
    params['lnf_w'], params['lnf_b'] = ln_params(model_dim)
    params['w_out'], params['b_out'] = linear(model_dim, label_dim)
    return params


# ----------------------------------- main -------------------------------------
if __name__ == "__main__":
    B, T = 2, 8
    num_blocks, data_dim, model_dim, label_dim = 2, 16, 32, 10
    num_heads, ff_hidden_dim = 4, 64            # head_dim = 8 (even, RoPE-compatible)

    key = jax.random.PRNGKey(0)
    pkey, tkey = jax.random.split(key)
    params = init_params(pkey, num_blocks, data_dim, model_dim, label_dim,
                         num_heads, ff_hidden_dim)
    tokens = jax.random.randint(tkey, (B, T), 0, data_dim, dtype=jnp.int32)

    packed, out_dim = pack_params(params, num_heads)
    fwd = jax.jit(functools.partial(causal_transformer_forward,
                                    num_heads=num_heads, label_dim=out_dim))
    out = jax.block_until_ready(fwd(tokens, packed))
    assert out.shape == (B, T, label_dim)

    ref = reference_forward(tokens, params, num_heads)
    err = float(jnp.max(jnp.abs(out - ref)))
    # bf16 matmul inputs + approx softmax reciprocal vs f32 reference -> looser tol.
    assert jnp.all(jnp.isfinite(out)), "non-finite output"
    assert err < 5e-2, f"mismatch vs reference: max abs err = {err}"

    print("KERNEL_OK")
</pallas_src>

<mosaic_0001>
module attributes {stable_mosaic.version = 11 : i64} {
  func.func @proj_ffn_kernel(%arg0: i32, %arg1: memref<8x32xf32, #tpu.memory_space<vmem>>, %arg2: memref<8x32xbf16, #tpu.memory_space<vmem>>, %arg3: memref<32x32xbf16, #tpu.memory_space<vmem>>, %arg4: memref<1x32xf32, #tpu.memory_space<vmem>>, %arg5: memref<1x32xf32, #tpu.memory_space<vmem>>, %arg6: memref<1x32xf32, #tpu.memory_space<vmem>>, %arg7: memref<32x64xbf16, #tpu.memory_space<vmem>>, %arg8: memref<1x64xf32, #tpu.memory_space<vmem>>, %arg9: memref<64x32xbf16, #tpu.memory_space<vmem>>, %arg10: memref<1x32xf32, #tpu.memory_space<vmem>>, %arg11: memref<8x32xf32, #tpu.memory_space<vmem>>) attributes {dimension_semantics = [#tpu.dimension_semantics<parallel>], iteration_bounds = array<i64: 2>, scalar_prefetch = 0 : i64, scratch_operands = 0 : i64, tpu.core_type = #tpu.core_type<tc>, window_params = [{transform_indices = @transform_0, window_bounds = array<i64: 8, 32>}, {transform_indices = @transform_1, window_bounds = array<i64: 8, 32>}, {pipeline_mode = #tpu.pipeline_mode<synchronous>, transform_indices = @transform_2, window_bounds = array<i64: 32, 32>}, {pipeline_mode = #tpu.pipeline_mode<synchronous>, transform_indices = @transform_3, window_bounds = array<i64: 1, 32>}, {pipeline_mode = #tpu.pipeline_mode<synchronous>, transform_indices = @transform_4, window_bounds = array<i64: 1, 32>}, {pipeline_mode = #tpu.pipeline_mode<synchronous>, transform_indices = @transform_5, window_bounds = array<i64: 1, 32>}, {pipeline_mode = #tpu.pipeline_mode<synchronous>, transform_indices = @transform_6, window_bounds = array<i64: 32, 64>}, {pipeline_mode = #tpu.pipeline_mode<synchronous>, transform_indices = @transform_7, window_bounds = array<i64: 1, 64>}, {pipeline_mode = #tpu.pipeline_mode<synchronous>, transform_indices = @transform_8, window_bounds = array<i64: 64, 32>}, {pipeline_mode = #tpu.pipeline_mode<synchronous>, transform_indices = @transform_9, window_bounds = array<i64: 1, 32>}, {transform_indices = @transform_10, window_bounds = array<i64: 8, 32>}]} {
    %c0 = arith.constant 0 : index
    %c0_0 = arith.constant 0 : index
    %0 = vector.load %arg1[%c0, %c0_0] : memref<8x32xf32, #tpu.memory_space<vmem>>, vector<8x32xf32>
    %c0_1 = arith.constant 0 : index
    %c0_2 = arith.constant 0 : index
    %1 = vector.load %arg2[%c0_1, %c0_2] : memref<8x32xbf16, #tpu.memory_space<vmem>>, vector<8x32xbf16>
    %c0_3 = arith.constant 0 : index
    %c0_4 = arith.constant 0 : index
    %2 = vector.load %arg3[%c0_3, %c0_4] : memref<32x32xbf16, #tpu.memory_space<vmem>>, vector<32x32xbf16>
    %cst = arith.constant dense<0.000000e+00> : vector<8x32xf32>
    %3 = tpu.matmul %1, %2, %cst {dimension_numbers = #tpu.dot_dimension_numbers<[1], [0], [0], [1], [0, 0, 1, 1], [], []>} : vector<8x32xbf16>, vector<32x32xbf16>, vector<8x32xf32> -> vector<8x32xf32>
    %c0_5 = arith.constant 0 : index
    %c0_6 = arith.constant 0 : index
    %4 = vector.load %arg4[%c0_5, %c0_6] : memref<1x32xf32, #tpu.memory_space<vmem>>, vector<1x32xf32>
    %5 = vector.broadcast %4 : vector<1x32xf32> to vector<8x32xf32>
    %6 = arith.addf %3, %5 : vector<8x32xf32>
    %7 = arith.addf %0, %6 : vector<8x32xf32>
    %c0_7 = arith.constant 0 : index
    %c0_8 = arith.constant 0 : index
    %8 = vector.load %arg5[%c0_7, %c0_8] : memref<1x32xf32, #tpu.memory_space<vmem>>, vector<1x32xf32>
    %c0_9 = arith.constant 0 : index
    %c0_10 = arith.constant 0 : index
    %9 = vector.load %arg6[%c0_9, %c0_10] : memref<1x32xf32, #tpu.memory_space<vmem>>, vector<1x32xf32>
    %cst_11 = arith.constant dense<0.000000e+00> : vector<8xf32>
    %10 = vector.multi_reduction <add>, %7, %cst_11 [1] : vector<8x32xf32> to vector<8xf32>
    %11 = vector.shape_cast %10 : vector<8xf32> to vector<8x1xf32>
    %cst_12 = arith.constant 3.200000e+01 : f32
    %12 = vector.broadcast %cst_12 : f32 to vector<8x1xf32>
    %13 = arith.divf %11, %12 : vector<8x1xf32>
    %14 = vector.broadcast %13 : vector<8x1xf32> to vector<8x32xf32>
    %15 = arith.subf %7, %14 : vector<8x32xf32>
    %16 = arith.mulf %15, %15 : vector<8x32xf32>
    %cst_13 = arith.constant dense<0.000000e+00> : vector<8xf32>
    %17 = vector.multi_reduction <add>, %16, %cst_13 [1] : vector<8x32xf32> to vector<8xf32>
    %18 = vector.shape_cast %17 : vector<8xf32> to vector<8x1xf32>
    %cst_14 = arith.constant 3.200000e+01 : f32
    %19 = vector.broadcast %cst_14 : f32 to vector<8x1xf32>
    %20 = arith.divf %18, %19 : vector<8x1xf32>
    %21 = vector.broadcast %13 : vector<8x1xf32> to vector<8x32xf32>
    %22 = arith.subf %7, %21 : vector<8x32xf32>
    %cst_15 = arith.constant 9.99999974E-6 : f32
    %23 = vector.broadcast %cst_15 : f32 to vector<8x1xf32>
    %24 = arith.addf %20, %23 : vector<8x1xf32>
    %25 = math.rsqrt %24 : vector<8x1xf32>
    %26 = vector.broadcast %25 : vector<8x1xf32> to vector<8x32xf32>
    %27 = arith.mulf %22, %26 : vector<8x32xf32>
    %28 = vector.broadcast %8 : vector<1x32xf32> to vector<8x32xf32>
    %29 = arith.mulf %27, %28 : vector<8x32xf32>
    %30 = vector.broadcast %9 : vector<1x32xf32> to vector<8x32xf32>
    %31 = arith.addf %29, %30 : vector<8x32xf32>
    %32 = arith.truncf %31 : vector<8x32xf32> to vector<8x32xbf16>
    %c0_16 = arith.constant 0 : index
    %c0_17 = arith.constant 0 : index
    %33 = vector.load %arg7[%c0_16, %c0_17] : memref<32x64xbf16, #tpu.memory_space<vmem>>, vector<32x64xbf16>
    %cst_18 = arith.constant dense<0.000000e+00> : vector<8x64xf32>
    %34 = tpu.matmul %32, %33, %cst_18 {dimension_numbers = #tpu.dot_dimension_numbers<[1], [0], [0], [1], [0, 0, 1, 1], [], []>} : vector<8x32xbf16>, vector<32x64xbf16>, vector<8x64xf32> -> vector<8x64xf32>
    %c0_19 = arith.constant 0 : index
    %c0_20 = arith.constant 0 : index
    %35 = vector.load %arg8[%c0_19, %c0_20] : memref<1x64xf32, #tpu.memory_space<vmem>>, vector<1x64xf32>
    %36 = vector.broadcast %35 : vector<1x64xf32> to vector<8x64xf32>
    %37 = arith.addf %34, %36 : vector<8x64xf32>
    %cst_21 = arith.constant 5.000000e-01 : f32
    %38 = vector.broadcast %cst_21 : f32 to vector<8x64xf32>
    %39 = arith.mulf %38, %37 : vector<8x64xf32>
    %cst_22 = arith.constant 0.707106769 : f32
    %40 = vector.broadcast %cst_22 : f32 to vector<8x64xf32>
    %41 = arith.mulf %37, %40 : vector<8x64xf32>
    %42 = math.erf %41 : vector<8x64xf32>
    %cst_23 = arith.constant 1.000000e+00 : f32
    %43 = vector.broadcast %cst_23 : f32 to vector<8x64xf32>
    %44 = arith.addf %43, %42 : vector<8x64xf32>
    %45 = arith.mulf %39, %44 : vector<8x64xf32>
    %46 = arith.truncf %45 : vector<8x64xf32> to vector<8x64xbf16>
    %c0_24 = arith.constant 0 : index
    %c0_25 = arith.constant 0 : index
    %47 = vector.load %arg9[%c0_24, %c0_25] : memref<64x32xbf16, #tpu.memory_space<vmem>>, vector<64x32xbf16>
    %cst_26 = arith.constant dense<0.000000e+00> : vector<8x32xf32>
    %48 = tpu.matmul %46, %47, %cst_26 {dimension_numbers = #tpu.dot_dimension_numbers<[1], [0], [0], [1], [0, 0, 1, 1], [], []>} : vector<8x64xbf16>, vector<64x32xbf16>, vector<8x32xf32> -> vector<8x32xf32>
    %c0_27 = arith.constant 0 : index
    %c0_28 = arith.constant 0 : index
    %49 = vector.load %arg10[%c0_27, %c0_28] : memref<1x32xf32, #tpu.memory_space<vmem>>, vector<1x32xf32>
    %50 = vector.broadcast %49 : vector<1x32xf32> to vector<8x32xf32>
    %51 = arith.addf %48, %50 : vector<8x32xf32>
    %52 = arith.addf %7, %51 : vector<8x32xf32>
    %c0_29 = arith.constant 0 : index
    %c0_30 = arith.constant 0 : index
    %53 = vector.load %arg11[%c0_29, %c0_30] : memref<8x32xf32, #tpu.memory_space<vmem>>, vector<8x32xf32>
    tpu.vector_store %arg11[%c0_29, %c0_30], %52 {strides = array<i32>} : memref<8x32xf32, #tpu.memory_space<vmem>>, vector<8x32xf32>,
    return
  }
  func.func @transform_0(%arg0: i32) -> (i32, i32) {
    %c0_i32 = arith.constant 0 : i32
    %c0_i32_0 = arith.constant 0 : i32
    return %arg0, %c0_i32 : i32, i32
  }
  func.func @transform_1(%arg0: i32) -> (i32, i32) {
    %c0_i32 = arith.constant 0 : i32
    %c0_i32_0 = arith.constant 0 : i32
    return %arg0, %c0_i32 : i32, i32
  }
  func.func @transform_2(%arg0: i32) -> (i32, i32) {
    %c0_i32 = arith.constant 0 : i32
    %c0_i32_0 = arith.constant 0 : i32
    %c0_i32_1 = arith.constant 0 : i32
    return %c0_i32, %c0_i32_0 : i32, i32
  }
  func.func @transform_3(%arg0: i32) -> (i32, i32) {
    %c0_i32 = arith.constant 0 : i32
    %c0_i32_0 = arith.constant 0 : i32
    %c0_i32_1 = arith.constant 0 : i32
    return %c0_i32, %c0_i32_0 : i32, i32
  }
  func.func @transform_4(%arg0: i32) -> (i32, i32) {
    %c0_i32 = arith.constant 0 : i32
    %c0_i32_0 = arith.constant 0 : i32
    %c0_i32_1 = arith.constant 0 : i32
    return %c0_i32, %c0_i32_0 : i32, i32
  }
  func.func @transform_5(%arg0: i32) -> (i32, i32) {
    %c0_i32 = arith.constant 0 : i32
    %c0_i32_0 = arith.constant 0 : i32
    %c0_i32_1 = arith.constant 0 : i32
    return %c0_i32, %c0_i32_0 : i32, i32
  }
  func.func @transform_6(%arg0: i32) -> (i32, i32) {
    %c0_i32 = arith.constant 0 : i32
    %c0_i32_0 = arith.constant 0 : i32
    %c0_i32_1 = arith.constant 0 : i32
    return %c0_i32, %c0_i32_0 : i32, i32
  }
  func.func @transform_7(%arg0: i32) -> (i32, i32) {
    %c0_i32 = arith.constant 0 : i32
    %c0_i32_0 = arith.constant 0 : i32
    %c0_i32_1 = arith.constant 0 : i32
    return %c0_i32, %c0_i32_0 : i32, i32
  }
  func.func @transform_8(%arg0: i32) -> (i32, i32) {
    %c0_i32 = arith.constant 0 : i32
    %c0_i32_0 = arith.constant 0 : i32
    %c0_i32_1 = arith.constant 0 : i32
    return %c0_i32, %c0_i32_0 : i32, i32
  }
  func.func @transform_9(%arg0: i32) -> (i32, i32) {
    %c0_i32 = arith.constant 0 : i32
    %c0_i32_0 = arith.constant 0 : i32
    %c0_i32_1 = arith.constant 0 : i32
    return %c0_i32, %c0_i32_0 : i32, i32
  }
  func.func @transform_10(%arg0: i32) -> (i32, i32) {
    %c0_i32 = arith.constant 0 : i32
    %c0_i32_0 = arith.constant 0 : i32
    return %arg0, %c0_i32 : i32, i32
  }
}

module attributes {stable_mosaic.version = 11 : i64} {
  func.func @qkv_attn_kernel(%arg0: i32, %arg1: memref<1x8x32xf32, #tpu.memory_space<vmem>>, %arg2: memref<1x32xf32, #tpu.memory_space<vmem>>, %arg3: memref<1x32xf32, #tpu.memory_space<vmem>>, %arg4: memref<32x96xbf16, #tpu.memory_space<vmem>>, %arg5: memref<1x96xf32, #tpu.memory_space<vmem>>, %arg6: memref<8x4xf32, #tpu.memory_space<vmem>>, %arg7: memref<8x4xf32, #tpu.memory_space<vmem>>, %arg8: memref<1x8x32xbf16, #tpu.memory_space<vmem>>) attributes {dimension_semantics = [#tpu.dimension_semantics<parallel>], iteration_bounds = array<i64: 2>, scalar_prefetch = 0 : i64, scratch_operands = 0 : i64, tpu.core_type = #tpu.core_type<tc>, window_params = [{transform_indices = @transform_0, window_bounds = array<i64: 1, 8, 32>}, {pipeline_mode = #tpu.pipeline_mode<synchronous>, transform_indices = @transform_1, window_bounds = array<i64: 1, 32>}, {pipeline_mode = #tpu.pipeline_mode<synchronous>, transform_indices = @transform_2, window_bounds = array<i64: 1, 32>}, {pipeline_mode = #tpu.pipeline_mode<synchronous>, transform_indices = @transform_3, window_bounds = array<i64: 32, 96>}, {pipeline_mode = #tpu.pipeline_mode<synchronous>, transform_indices = @transform_4, window_bounds = array<i64: 1, 96>}, {pipeline_mode = #tpu.pipeline_mode<synchronous>, transform_indices = @transform_5, window_bounds = array<i64: 8, 4>}, {pipeline_mode = #tpu.pipeline_mode<synchronous>, transform_indices = @transform_6, window_bounds = array<i64: 8, 4>}, {transform_indices = @transform_7, window_bounds = array<i64: 1, 8, 32>}]} {
    %c0 = arith.constant 0 : index
    %c0_0 = arith.constant 0 : index
    %c0_1 = arith.constant 0 : index
    %0 = vector.load %arg1[%c0, %c0_0, %c0_1] : memref<1x8x32xf32, #tpu.memory_space<vmem>>, vector<1x8x32xf32>
    %1 = vector.shape_cast %0 : vector<1x8x32xf32> to vector<8x32xf32>
    %c0_2 = arith.constant 0 : index
    %c0_3 = arith.constant 0 : index
    %2 = vector.load %arg2[%c0_2, %c0_3] : memref<1x32xf32, #tpu.memory_space<vmem>>, vector<1x32xf32>
    %c0_4 = arith.constant 0 : index
    %c0_5 = arith.constant 0 : index
    %3 = vector.load %arg3[%c0_4, %c0_5] : memref<1x32xf32, #tpu.memory_space<vmem>>, vector<1x32xf32>
    %cst = arith.constant dense<0.000000e+00> : vector<8xf32>
    %4 = vector.multi_reduction <add>, %1, %cst [1] : vector<8x32xf32> to vector<8xf32>
    %5 = vector.shape_cast %4 : vector<8xf32> to vector<8x1xf32>
    %cst_6 = arith.constant 3.200000e+01 : f32
    %6 = vector.broadcast %cst_6 : f32 to vector<8x1xf32>
    %7 = arith.divf %5, %6 : vector<8x1xf32>
    %8 = vector.broadcast %7 : vector<8x1xf32> to vector<8x32xf32>
    %9 = arith.subf %1, %8 : vector<8x32xf32>
    %10 = arith.mulf %9, %9 : vector<8x32xf32>
    %cst_7 = arith.constant dense<0.000000e+00> : vector<8xf32>
    %11 = vector.multi_reduction <add>, %10, %cst_7 [1] : vector<8x32xf32> to vector<8xf32>
    %12 = vector.shape_cast %11 : vector<8xf32> to vector<8x1xf32>
    %cst_8 = arith.constant 3.200000e+01 : f32
    %13 = vector.broadcast %cst_8 : f32 to vector<8x1xf32>
    %14 = arith.divf %12, %13 : vector<8x1xf32>
    %15 = vector.broadcast %7 : vector<8x1xf32> to vector<8x32xf32>
    %16 = arith.subf %1, %15 : vector<8x32xf32>
    %cst_9 = arith.constant 9.99999974E-6 : f32
    %17 = vector.broadcast %cst_9 : f32 to vector<8x1xf32>
    %18 = arith.addf %14, %17 : vector<8x1xf32>
    %19 = math.rsqrt %18 : vector<8x1xf32>
    %20 = vector.broadcast %19 : vector<8x1xf32> to vector<8x32xf32>
    %21 = arith.mulf %16, %20 : vector<8x32xf32>
    %22 = vector.broadcast %2 : vector<1x32xf32> to vector<8x32xf32>
    %23 = arith.mulf %21, %22 : vector<8x32xf32>
    %24 = vector.broadcast %3 : vector<1x32xf32> to vector<8x32xf32>
    %25 = arith.addf %23, %24 : vector<8x32xf32>
    %26 = arith.truncf %25 : vector<8x32xf32> to vector<8x32xbf16>
    %c0_10 = arith.constant 0 : index
    %c0_11 = arith.constant 0 : index
    %27 = vector.load %arg4[%c0_10, %c0_11] : memref<32x96xbf16, #tpu.memory_space<vmem>>, vector<32x96xbf16>
    %cst_12 = arith.constant dense<0.000000e+00> : vector<8x96xf32>
    %28 = tpu.matmul %26, %27, %cst_12 {dimension_numbers = #tpu.dot_dimension_numbers<[1], [0], [0], [1], [0, 0, 1, 1], [], []>} : vector<8x32xbf16>, vector<32x96xbf16>, vector<8x96xf32> -> vector<8x96xf32>
    %c0_13 = arith.constant 0 : index
    %c0_14 = arith.constant 0 : index
    %29 = vector.load %arg5[%c0_13, %c0_14] : memref<1x96xf32, #tpu.memory_space<vmem>>, vector<1x96xf32>
    %30 = vector.broadcast %29 : vector<1x96xf32> to vector<8x96xf32>
    %31 = arith.addf %28, %30 : vector<8x96xf32>
    %c0_15 = arith.constant 0 : index
    %c0_16 = arith.constant 0 : index
    %32 = vector.load %arg6[%c0_15, %c0_16] : memref<8x4xf32, #tpu.memory_space<vmem>>, vector<8x4xf32>
    %c0_17 = arith.constant 0 : index
    %c0_18 = arith.constant 0 : index
    %33 = vector.load %arg7[%c0_17, %c0_18] : memref<8x4xf32, #tpu.memory_space<vmem>>, vector<8x4xf32>
    %34 = tpu.iota {dimensions = array<i32: 0>} : vector<8x8xi32>
    %35 = tpu.iota {dimensions = array<i32: 1>} : vector<8x8xi32>
    %36 = arith.cmpi sle, %35, %34 : vector<8x8xi32>
    %37 = vector.extract_strided_slice %31 {offsets = [0, 0], sizes = [8, 8], strides = [1, 1]} : vector<8x96xf32> to vector<8x8xf32>
    %38 = vector.extract_strided_slice %31 {offsets = [0, 32], sizes = [8, 8], strides = [1, 1]} : vector<8x96xf32> to vector<8x8xf32>
    %39 = vector.extract_strided_slice %31 {offsets = [0, 64], sizes = [8, 8], strides = [1, 1]} : vector<8x96xf32> to vector<8x8xf32>
    %40 = vector.extract_strided_slice %37 {offsets = [0, 0], sizes = [8, 4], strides = [1, 1]} : vector<8x8xf32> to vector<8x4xf32>
    %41 = vector.extract_strided_slice %37 {offsets = [0, 4], sizes = [8, 4], strides = [1, 1]} : vector<8x8xf32> to vector<8x4xf32>
    %42 = vector.extract_strided_slice %38 {offsets = [0, 0], sizes = [8, 4], strides = [1, 1]} : vector<8x8xf32> to vector<8x4xf32>
    %43 = vector.extract_strided_slice %38 {offsets = [0, 4], sizes = [8, 4], strides = [1, 1]} : vector<8x8xf32> to vector<8x4xf32>
    %44 = arith.mulf %40, %32 : vector<8x4xf32>
    %45 = arith.mulf %41, %33 : vector<8x4xf32>
    %46 = arith.subf %44, %45 : vector<8x4xf32>
    %47 = arith.mulf %41, %32 : vector<8x4xf32>
    %48 = arith.mulf %40, %33 : vector<8x4xf32>
    %49 = arith.addf %47, %48 : vector<8x4xf32>
    %50 = tpu.concatenate %46, %49 in 1 : vector<8x4xf32>, vector<8x4xf32> -> vector<8x8xf32>
    %51 = arith.mulf %42, %32 : vector<8x4xf32>
    %52 = arith.mulf %43, %33 : vector<8x4xf32>
    %53 = arith.subf %51, %52 : vector<8x4xf32>
    %54 = arith.mulf %43, %32 : vector<8x4xf32>
    %55 = arith.mulf %42, %33 : vector<8x4xf32>
    %56 = arith.addf %54, %55 : vector<8x4xf32>
    %57 = tpu.concatenate %53, %56 in 1 : vector<8x4xf32>, vector<8x4xf32> -> vector<8x8xf32>
    %58 = arith.truncf %50 : vector<8x8xf32> to vector<8x8xbf16>
    %59 = arith.truncf %57 : vector<8x8xf32> to vector<8x8xbf16>
    %cst_19 = arith.constant dense<0.000000e+00> : vector<8x8xf32>
    %60 = tpu.matmul %58, %59, %cst_19 {dimension_numbers = #tpu.dot_dimension_numbers<[1], [1], [0], [0], [0, 0, 1, 0], [], []>} : vector<8x8xbf16>, vector<8x8xbf16>, vector<8x8xf32> -> vector<8x8xf32>
    %cst_20 = arith.constant 0.353553385 : f32
    %61 = vector.broadcast %cst_20 : f32 to vector<8x8xf32>
    %62 = arith.mulf %60, %61 : vector<8x8xf32>
    %cst_21 = arith.constant -1.000000e+30 : f32
    %63 = vector.broadcast %cst_21 : f32 to vector<8x8xf32>
    %64 = arith.select %36, %62, %63 : vector<8x8xi1>, vector<8x8xf32>
    %cst_22 = arith.constant dense<0xFF800000> : vector<8xf32>
    %65 = vector.multi_reduction <maximumf>, %64, %cst_22 [1] : vector<8x8xf32> to vector<8xf32>
    %66 = vector.shape_cast %65 : vector<8xf32> to vector<8x1xf32>
    %67 = vector.broadcast %66 : vector<8x1xf32> to vector<8x8xf32>
    %68 = arith.subf %64, %67 : vector<8x8xf32>
    %69 = math.exp %68 : vector<8x8xf32>
    %cst_23 = arith.constant dense<0.000000e+00> : vector<8xf32>
    %70 = vector.multi_reduction <add>, %69, %cst_23 [1] : vector<8x8xf32> to vector<8xf32>
    %71 = vector.shape_cast %70 : vector<8xf32> to vector<8x1xf32>
    %72 = tpu.reciprocal %71 {approx = true} : vector<8x1xf32> -> vector<8x1xf32>
    %73 = vector.broadcast %72 : vector<8x1xf32> to vector<8x8xf32>
    %74 = arith.mulf %69, %73 : vector<8x8xf32>
    %75 = arith.truncf %74 : vector<8x8xf32> to vector<8x8xbf16>
    %76 = arith.truncf %39 : vector<8x8xf32> to vector<8x8xbf16>
    %cst_24 = arith.constant dense<0.000000e+00> : vector<8x8xf32>
    %77 = tpu.matmul %75, %76, %cst_24 {dimension_numbers = #tpu.dot_dimension_numbers<[1], [0], [0], [1], [0, 0, 1, 1], [], []>} : vector<8x8xbf16>, vector<8x8xbf16>, vector<8x8xf32> -> vector<8x8xf32>
    %78 = arith.truncf %77 : vector<8x8xf32> to vector<8x8xbf16>
    %79 = vector.extract_strided_slice %31 {offsets = [0, 8], sizes = [8, 8], strides = [1, 1]} : vector<8x96xf32> to vector<8x8xf32>
    %80 = vector.extract_strided_slice %31 {offsets = [0, 40], sizes = [8, 8], strides = [1, 1]} : vector<8x96xf32> to vector<8x8xf32>
    %81 = vector.extract_strided_slice %31 {offsets = [0, 72], sizes = [8, 8], strides = [1, 1]} : vector<8x96xf32> to vector<8x8xf32>
    %82 = vector.extract_strided_slice %79 {offsets = [0, 0], sizes = [8, 4], strides = [1, 1]} : vector<8x8xf32> to vector<8x4xf32>
    %83 = vector.extract_strided_slice %79 {offsets = [0, 4], sizes = [8, 4], strides = [1, 1]} : vector<8x8xf32> to vector<8x4xf32>
    %84 = vector.extract_strided_slice %80 {offsets = [0, 0], sizes = [8, 4], strides = [1, 1]} : vector<8x8xf32> to vector<8x4xf32>
    %85 = vector.extract_strided_slice %80 {offsets = [0, 4], sizes = [8, 4], strides = [1, 1]} : vector<8x8xf32> to vector<8x4xf32>
    %86 = arith.mulf %82, %32 : vector<8x4xf32>
    %87 = arith.mulf %83, %33 : vector<8x4xf32>
    %88 = arith.subf %86, %87 : vector<8x4xf32>
    %89 = arith.mulf %83, %32 : vector<8x4xf32>
    %90 = arith.mulf %82, %33 : vector<8x4xf32>
    %91 = arith.addf %89, %90 : vector<8x4xf32>
    %92 = tpu.concatenate %88, %91 in 1 : vector<8x4xf32>, vector<8x4xf32> -> vector<8x8xf32>
    %93 = arith.mulf %84, %32 : vector<8x4xf32>
    %94 = arith.mulf %85, %33 : vector<8x4xf32>
    %95 = arith.subf %93, %94 : vector<8x4xf32>
    %96 = arith.mulf %85, %32 : vector<8x4xf32>
    %97 = arith.mulf %84, %33 : vector<8x4xf32>
    %98 = arith.addf %96, %97 : vector<8x4xf32>
    %99 = tpu.concatenate %95, %98 in 1 : vector<8x4xf32>, vector<8x4xf32> -> vector<8x8xf32>
    %100 = arith.truncf %92 : vector<8x8xf32> to vector<8x8xbf16>
    %101 = arith.truncf %99 : vector<8x8xf32> to vector<8x8xbf16>
    %cst_25 = arith.constant dense<0.000000e+00> : vector<8x8xf32>
    %102 = tpu.matmul %100, %101, %cst_25 {dimension_numbers = #tpu.dot_dimension_numbers<[1], [1], [0], [0], [0, 0, 1, 0], [], []>} : vector<8x8xbf16>, vector<8x8xbf16>, vector<8x8xf32> -> vector<8x8xf32>
    %cst_26 = arith.constant 0.353553385 : f32
    %103 = vector.broadcast %cst_26 : f32 to vector<8x8xf32>
    %104 = arith.mulf %102, %103 : vector<8x8xf32>
    %cst_27 = arith.constant -1.000000e+30 : f32
    %105 = vector.broadcast %cst_27 : f32 to vector<8x8xf32>
    %106 = arith.select %36, %104, %105 : vector<8x8xi1>, vector<8x8xf32>
    %cst_28 = arith.constant dense<0xFF800000> : vector<8xf32>
    %107 = vector.multi_reduction <maximumf>, %106, %cst_28 [1] : vector<8x8xf32> to vector<8xf32>
    %108 = vector.shape_cast %107 : vector<8xf32> to vector<8x1xf32>
    %109 = vector.broadcast %108 : vector<8x1xf32> to vector<8x8xf32>
    %110 = arith.subf %106, %109 : vector<8x8xf32>
    %111 = math.exp %110 : vector<8x8xf32>
    %cst_29 = arith.constant dense<0.000000e+00> : vector<8xf32>
    %112 = vector.multi_reduction <add>, %111, %cst_29 [1] : vector<8x8xf32> to vector<8xf32>
    %113 = vector.shape_cast %112 : vector<8xf32> to vector<8x1xf32>
    %114 = tpu.reciprocal %113 {approx = true} : vector<8x1xf32> -> vector<8x1xf32>
    %115 = vector.broadcast %114 : vector<8x1xf32> to vector<8x8xf32>
    %116 = arith.mulf %111, %115 : vector<8x8xf32>
    %117 = arith.truncf %116 : vector<8x8xf32> to vector<8x8xbf16>
    %118 = arith.truncf %81 : vector<8x8xf32> to vector<8x8xbf16>
    %cst_30 = arith.constant dense<0.000000e+00> : vector<8x8xf32>
    %119 = tpu.matmul %117, %118, %cst_30 {dimension_numbers = #tpu.dot_dimension_numbers<[1], [0], [0], [1], [0, 0, 1, 1], [], []>} : vector<8x8xbf16>, vector<8x8xbf16>, vector<8x8xf32> -> vector<8x8xf32>
    %120 = arith.truncf %119 : vector<8x8xf32> to vector<8x8xbf16>
    %121 = vector.extract_strided_slice %31 {offsets = [0, 16], sizes = [8, 8], strides = [1, 1]} : vector<8x96xf32> to vector<8x8xf32>
    %122 = vector.extract_strided_slice %31 {offsets = [0, 48], sizes = [8, 8], strides = [1, 1]} : vector<8x96xf32> to vector<8x8xf32>
    %123 = vector.extract_strided_slice %31 {offsets = [0, 80], sizes = [8, 8], strides = [1, 1]} : vector<8x96xf32> to vector<8x8xf32>
    %124 = vector.extract_strided_slice %121 {offsets = [0, 0], sizes = [8, 4], strides = [1, 1]} : vector<8x8xf32> to vector<8x4xf32>
    %125 = vector.extract_strided_slice %121 {offsets = [0, 4], sizes = [8, 4], strides = [1, 1]} : vector<8x8xf32> to vector<8x4xf32>
    %126 = vector.extract_strided_slice %122 {offsets = [0, 0], sizes = [8, 4], strides = [1, 1]} : vector<8x8xf32> to vector<8x4xf32>
    %127 = vector.extract_strided_slice %122 {offsets = [0, 4], sizes = [8, 4], strides = [1, 1]} : vector<8x8xf32> to vector<8x4xf32>
    %128 = arith.mulf %124, %32 : vector<8x4xf32>
    %129 = arith.mulf %125, %33 : vector<8x4xf32>
    %130 = arith.subf %128, %129 : vector<8x4xf32>
    %131 = arith.mulf %125, %32 : vector<8x4xf32>
    %132 = arith.mulf %124, %33 : vector<8x4xf32>
    %133 = arith.addf %131, %132 : vector<8x4xf32>
    %134 = tpu.concatenate %130, %133 in 1 : vector<8x4xf32>, vector<8x4xf32> -> vector<8x8xf32>
    %135 = arith.mulf %126, %32 : vector<8x4xf32>
    %136 = arith.mulf %127, %33 : vector<8x4xf32>
    %137 = arith.subf %135, %136 : vector<8x4xf32>
    %138 = arith.mulf %127, %32 : vector<8x4xf32>
    %139 = arith.mulf %126, %33 : vector<8x4xf32>
    %140 = arith.addf %138, %139 : vector<8x4xf32>
    %141 = tpu.concatenate %137, %140 in 1 : vector<8x4xf32>, vector<8x4xf32> -> vector<8x8xf32>
    %142 = arith.truncf %134 : vector<8x8xf32> to vector<8x8xbf16>
    %143 = arith.truncf %141 : vector<8x8xf32> to vector<8x8xbf16>
    %cst_31 = arith.constant dense<0.000000e+00> : vector<8x8xf32>
    %144 = tpu.matmul %142, %143, %cst_31 {dimension_numbers = #tpu.dot_dimension_numbers<[1], [1], [0], [0], [0, 0, 1, 0], [], []>} : vector<8x8xbf16>, vector<8x8xbf16>, vector<8x8xf32> -> vector<8x8xf32>
    %cst_32 = arith.constant 0.353553385 : f32
    %145 = vector.broadcast %cst_32 : f32 to vector<8x8xf32>
    %146 = arith.mulf %144, %145 : vector<8x8xf32>
    %cst_33 = arith.constant -1.000000e+30 : f32
    %147 = vector.broadcast %cst_33 : f32 to vector<8x8xf32>
    %148 = arith.select %36, %146, %147 : vector<8x8xi1>, vector<8x8xf32>
    %cst_34 = arith.constant dense<0xFF800000> : vector<8xf32>
    %149 = vector.multi_reduction <maximumf>, %148, %cst_34 [1] : vector<8x8xf32> to vector<8xf32>
    %150 = vector.shape_cast %149 : vector<8xf32> to vector<8x1xf32>
    %151 = vector.broadcast %150 : vector<8x1xf32> to vector<8x8xf32>
    %152 = arith.subf %148, %151 : vector<8x8xf32>
    %153 = math.exp %152 : vector<8x8xf32>
    %cst_35 = arith.constant dense<0.000000e+00> : vector<8xf32>
    %154 = vector.multi_reduction <add>, %153, %cst_35 [1] : vector<8x8xf32> to vector<8xf32>
    %155 = vector.shape_cast %154 : vector<8xf32> to vector<8x1xf32>
    %156 = tpu.reciprocal %155 {approx = true} : vector<8x1xf32> -> vector<8x1xf32>
    %157 = vector.broadcast %156 : vector<8x1xf32> to vector<8x8xf32>
    %158 = arith.mulf %153, %157 : vector<8x8xf32>
    %159 = arith.truncf %158 : vector<8x8xf32> to vector<8x8xbf16>
    %160 = arith.truncf %123 : vector<8x8xf32> to vector<8x8xbf16>
    %cst_36 = arith.constant dense<0.000000e+00> : vector<8x8xf32>
    %161 = tpu.matmul %159, %160, %cst_36 {dimension_numbers = #tpu.dot_dimension_numbers<[1], [0], [0], [1], [0, 0, 1, 1], [], []>} : vector<8x8xbf16>, vector<8x8xbf16>, vector<8x8xf32> -> vector<8x8xf32>
    %162 = arith.truncf %161 : vector<8x8xf32> to vector<8x8xbf16>
    %163 = vector.extract_strided_slice %31 {offsets = [0, 24], sizes = [8, 8], strides = [1, 1]} : vector<8x96xf32> to vector<8x8xf32>
    %164 = vector.extract_strided_slice %31 {offsets = [0, 56], sizes = [8, 8], strides = [1, 1]} : vector<8x96xf32> to vector<8x8xf32>
    %165 = vector.extract_strided_slice %31 {offsets = [0, 88], sizes = [8, 8], strides = [1, 1]} : vector<8x96xf32> to vector<8x8xf32>
    %166 = vector.extract_strided_slice %163 {offsets = [0, 0], sizes = [8, 4], strides = [1, 1]} : vector<8x8xf32> to vector<8x4xf32>
    %167 = vector.extract_strided_slice %163 {offsets = [0, 4], sizes = [8, 4], strides = [1, 1]} : vector<8x8xf32> to vector<8x4xf32>
    %168 = vector.extract_strided_slice %164 {offsets = [0, 0], sizes = [8, 4], strides = [1, 1]} : vector<8x8xf32> to vector<8x4xf32>
    %169 = vector.extract_strided_slice %164 {offsets = [0, 4], sizes = [8, 4], strides = [1, 1]} : vector<8x8xf32> to vector<8x4xf32>
    %170 = arith.mulf %166, %32 : vector<8x4xf32>
    %171 = arith.mulf %167, %33 : vector<8x4xf32>
    %172 = arith.subf %170, %171 : vector<8x4xf32>
    %173 = arith.mulf %167, %32 : vector<8x4xf32>
    %174 = arith.mulf %166, %33 : vector<8x4xf32>
    %175 = arith.addf %173, %174 : vector<8x4xf32>
    %176 = tpu.concatenate %172, %175 in 1 : vector<8x4xf32>, vector<8x4xf32> -> vector<8x8xf32>
    %177 = arith.mulf %168, %32 : vector<8x4xf32>
    %178 = arith.mulf %169, %33 : vector<8x4xf32>
    %179 = arith.subf %177, %178 : vector<8x4xf32>
    %180 = arith.mulf %169, %32 : vector<8x4xf32>
    %181 = arith.mulf %168, %33 : vector<8x4xf32>
    %182 = arith.addf %180, %181 : vector<8x4xf32>
    %183 = tpu.concatenate %179, %182 in 1 : vector<8x4xf32>, vector<8x4xf32> -> vector<8x8xf32>
    %184 = arith.truncf %176 : vector<8x8xf32> to vector<8x8xbf16>
    %185 = arith.truncf %183 : vector<8x8xf32> to vector<8x8xbf16>
    %cst_37 = arith.constant dense<0.000000e+00> : vector<8x8xf32>
    %186 = tpu.matmul %184, %185, %cst_37 {dimension_numbers = #tpu.dot_dimension_numbers<[1], [1], [0], [0], [0, 0, 1, 0], [], []>} : vector<8x8xbf16>, vector<8x8xbf16>, vector<8x8xf32> -> vector<8x8xf32>
    %cst_38 = arith.constant 0.353553385 : f32
    %187 = vector.broadcast %cst_38 : f32 to vector<8x8xf32>
    %188 = arith.mulf %186, %187 : vector<8x8xf32>
    %cst_39 = arith.constant -1.000000e+30 : f32
    %189 = vector.broadcast %cst_39 : f32 to vector<8x8xf32>
    %190 = arith.select %36, %188, %189 : vector<8x8xi1>, vector<8x8xf32>
    %cst_40 = arith.constant dense<0xFF800000> : vector<8xf32>
    %191 = vector.multi_reduction <maximumf>, %190, %cst_40 [1] : vector<8x8xf32> to vector<8xf32>
    %192 = vector.shape_cast %191 : vector<8xf32> to vector<8x1xf32>
    %193 = vector.broadcast %192 : vector<8x1xf32> to vector<8x8xf32>
    %194 = arith.subf %190, %193 : vector<8x8xf32>
    %195 = math.exp %194 : vector<8x8xf32>
    %cst_41 = arith.constant dense<0.000000e+00> : vector<8xf32>
    %196 = vector.multi_reduction <add>, %195, %cst_41 [1] : vector<8x8xf32> to vector<8xf32>
    %197 = vector.shape_cast %196 : vector<8xf32> to vector<8x1xf32>
    %198 = tpu.reciprocal %197 {approx = true} : vector<8x1xf32> -> vector<8x1xf32>
    %199 = vector.broadcast %198 : vector<8x1xf32> to vector<8x8xf32>
    %200 = arith.mulf %195, %199 : vector<8x8xf32>
    %201 = arith.truncf %200 : vector<8x8xf32> to vector<8x8xbf16>
    %202 = arith.truncf %165 : vector<8x8xf32> to vector<8x8xbf16>
    %cst_42 = arith.constant dense<0.000000e+00> : vector<8x8xf32>
    %203 = tpu.matmul %201, %202, %cst_42 {dimension_numbers = #tpu.dot_dimension_numbers<[1], [0], [0], [1], [0, 0, 1, 1], [], []>} : vector<8x8xbf16>, vector<8x8xbf16>, vector<8x8xf32> -> vector<8x8xf32>
    %204 = arith.truncf %203 : vector<8x8xf32> to vector<8x8xbf16>
    %205 = tpu.concatenate %78, %120, %162, %204 in 1 : vector<8x8xbf16>, vector<8x8xbf16>, vector<8x8xbf16>, vector<8x8xbf16> -> vector<8x32xbf16>
    %c0_43 = arith.constant 0 : index
    %c0_44 = arith.constant 0 : index
    %c0_45 = arith.constant 0 : index
    %206 = vector.load %arg8[%c0_43, %c0_44, %c0_45] : memref<1x8x32xbf16, #tpu.memory_space<vmem>>, vector<1x8x32xbf16>
    %207 = vector.shape_cast %206 : vector<1x8x32xbf16> to vector<8x32xbf16>
    %208 = vector.shape_cast %205 : vector<8x32xbf16> to vector<1x8x32xbf16>
    tpu.vector_store %arg8[%c0_43, %c0_44, %c0_45], %208 {strides = array<i32>} : memref<1x8x32xbf16, #tpu.memory_space<vmem>>, vector<1x8x32xbf16>,
    return
  }
  func.func @transform_0(%arg0: i32) -> (i32, i32, i32) {
    %c0_i32 = arith.constant 0 : i32
    %c0_i32_0 = arith.constant 0 : i32
    %c0_i32_1 = arith.constant 0 : i32
    return %arg0, %c0_i32, %c0_i32_0 : i32, i32, i32
  }
  func.func @transform_1(%arg0: i32) -> (i32, i32) {
    %c0_i32 = arith.constant 0 : i32
    %c0_i32_0 = arith.constant 0 : i32
    %c0_i32_1 = arith.constant 0 : i32
    return %c0_i32, %c0_i32_0 : i32, i32
  }
  func.func @transform_2(%arg0: i32) -> (i32, i32) {
    %c0_i32 = arith.constant 0 : i32
    %c0_i32_0 = arith.constant 0 : i32
    %c0_i32_1 = arith.constant 0 : i32
    return %c0_i32, %c0_i32_0 : i32, i32
  }
  func.func @transform_3(%arg0: i32) -> (i32, i32) {
    %c0_i32 = arith.constant 0 : i32
    %c0_i32_0 = arith.constant 0 : i32
    %c0_i32_1 = arith.constant 0 : i32
    return %c0_i32, %c0_i32_0 : i32, i32
  }
  func.func @transform_4(%arg0: i32) -> (i32, i32) {
    %c0_i32 = arith.constant 0 : i32
    %c0_i32_0 = arith.constant 0 : i32
    %c0_i32_1 = arith.constant 0 : i32
    return %c0_i32, %c0_i32_0 : i32, i32
  }
  func.func @transform_5(%arg0: i32) -> (i32, i32) {
    %c0_i32 = arith.constant 0 : i32
    %c0_i32_0 = arith.constant 0 : i32
    %c0_i32_1 = arith.constant 0 : i32
    return %c0_i32, %c0_i32_0 : i32, i32
  }
  func.func @transform_6(%arg0: i32) -> (i32, i32) {
    %c0_i32 = arith.constant 0 : i32
    %c0_i32_0 = arith.constant 0 : i32
    %c0_i32_1 = arith.constant 0 : i32
    return %c0_i32, %c0_i32_0 : i32, i32
  }
  func.func @transform_7(%arg0: i32) -> (i32, i32, i32) {
    %c0_i32 = arith.constant 0 : i32
    %c0_i32_0 = arith.constant 0 : i32
    %c0_i32_1 = arith.constant 0 : i32
    return %arg0, %c0_i32, %c0_i32_0 : i32, i32, i32
  }
}

module attributes {stable_mosaic.version = 11 : i64} {
  func.func @head_kernel(%arg0: i32, %arg1: memref<8x32xf32, #tpu.memory_space<vmem>>, %arg2: memref<1x32xf32, #tpu.memory_space<vmem>>, %arg3: memref<1x32xf32, #tpu.memory_space<vmem>>, %arg4: memref<32x128xbf16, #tpu.memory_space<vmem>>, %arg5: memref<1x128xf32, #tpu.memory_space<vmem>>, %arg6: memref<8x128xf32, #tpu.memory_space<vmem>>) attributes {dimension_semantics = [#tpu.dimension_semantics<parallel>], iteration_bounds = array<i64: 2>, scalar_prefetch = 0 : i64, scratch_operands = 0 : i64, tpu.core_type = #tpu.core_type<tc>, window_params = [{transform_indices = @transform_0, window_bounds = array<i64: 8, 32>}, {pipeline_mode = #tpu.pipeline_mode<synchronous>, transform_indices = @transform_1, window_bounds = array<i64: 1, 32>}, {pipeline_mode = #tpu.pipeline_mode<synchronous>, transform_indices = @transform_2, window_bounds = array<i64: 1, 32>}, {pipeline_mode = #tpu.pipeline_mode<synchronous>, transform_indices = @transform_3, window_bounds = array<i64: 32, 128>}, {pipeline_mode = #tpu.pipeline_mode<synchronous>, transform_indices = @transform_4, window_bounds = array<i64: 1, 128>}, {transform_indices = @transform_5, window_bounds = array<i64: 8, 128>}]} {
    %c0 = arith.constant 0 : index
    %c0_0 = arith.constant 0 : index
    %0 = vector.load %arg1[%c0, %c0_0] : memref<8x32xf32, #tpu.memory_space<vmem>>, vector<8x32xf32>
    %c0_1 = arith.constant 0 : index
    %c0_2 = arith.constant 0 : index
    %1 = vector.load %arg2[%c0_1, %c0_2] : memref<1x32xf32, #tpu.memory_space<vmem>>, vector<1x32xf32>
    %c0_3 = arith.constant 0 : index
    %c0_4 = arith.constant 0 : index
    %2 = vector.load %arg3[%c0_3, %c0_4] : memref<1x32xf32, #tpu.memory_space<vmem>>, vector<1x32xf32>
    %cst = arith.constant dense<0.000000e+00> : vector<8xf32>
    %3 = vector.multi_reduction <add>, %0, %cst [1] : vector<8x32xf32> to vector<8xf32>
    %4 = vector.shape_cast %3 : vector<8xf32> to vector<8x1xf32>
    %cst_5 = arith.constant 3.200000e+01 : f32
    %5 = vector.broadcast %cst_5 : f32 to vector<8x1xf32>
    %6 = arith.divf %4, %5 : vector<8x1xf32>
    %7 = vector.broadcast %6 : vector<8x1xf32> to vector<8x32xf32>
    %8 = arith.subf %0, %7 : vector<8x32xf32>
    %9 = arith.mulf %8, %8 : vector<8x32xf32>
    %cst_6 = arith.constant dense<0.000000e+00> : vector<8xf32>
    %10 = vector.multi_reduction <add>, %9, %cst_6 [1] : vector<8x32xf32> to vector<8xf32>
    %11 = vector.shape_cast %10 : vector<8xf32> to vector<8x1xf32>
    %cst_7 = arith.constant 3.200000e+01 : f32
    %12 = vector.broadcast %cst_7 : f32 to vector<8x1xf32>
    %13 = arith.divf %11, %12 : vector<8x1xf32>
    %14 = vector.broadcast %6 : vector<8x1xf32> to vector<8x32xf32>
    %15 = arith.subf %0, %14 : vector<8x32xf32>
    %cst_8 = arith.constant 9.99999974E-6 : f32
    %16 = vector.broadcast %cst_8 : f32 to vector<8x1xf32>
    %17 = arith.addf %13, %16 : vector<8x1xf32>
    %18 = math.rsqrt %17 : vector<8x1xf32>
    %19 = vector.broadcast %18 : vector<8x1xf32> to vector<8x32xf32>
    %20 = arith.mulf %15, %19 : vector<8x32xf32>
    %21 = vector.broadcast %1 : vector<1x32xf32> to vector<8x32xf32>
    %22 = arith.mulf %20, %21 : vector<8x32xf32>
    %23 = vector.broadcast %2 : vector<1x32xf32> to vector<8x32xf32>
    %24 = arith.addf %22, %23 : vector<8x32xf32>
    %25 = arith.truncf %24 : vector<8x32xf32> to vector<8x32xbf16>
    %c0_9 = arith.constant 0 : index
    %c0_10 = arith.constant 0 : index
    %26 = vector.load %arg4[%c0_9, %c0_10] : memref<32x128xbf16, #tpu.memory_space<vmem>>, vector<32x128xbf16>
    %cst_11 = arith.constant dense<0.000000e+00> : vector<8x128xf32>
    %27 = tpu.matmul %25, %26, %cst_11 {dimension_numbers = #tpu.dot_dimension_numbers<[1], [0], [0], [1], [0, 0, 1, 1], [], []>} : vector<8x32xbf16>, vector<32x128xbf16>, vector<8x128xf32> -> vector<8x128xf32>
    %c0_12 = arith.constant 0 : index
    %c0_13 = arith.constant 0 : index
    %28 = vector.load %arg5[%c0_12, %c0_13] : memref<1x128xf32, #tpu.memory_space<vmem>>, vector<1x128xf32>
    %29 = vector.broadcast %28 : vector<1x128xf32> to vector<8x128xf32>
    %30 = arith.addf %27, %29 : vector<8x128xf32>
    %c0_14 = arith.constant 0 : index
    %c0_15 = arith.constant 0 : index
    %31 = vector.load %arg6[%c0_14, %c0_15] : memref<8x128xf32, #tpu.memory_space<vmem>>, vector<8x128xf32>
    tpu.vector_store %arg6[%c0_14, %c0_15], %30 {strides = array<i32>} : memref<8x128xf32, #tpu.memory_space<vmem>>, vector<8x128xf32>,
    return
  }
  func.func @transform_0(%arg0: i32) -> (i32, i32) {
    %c0_i32 = arith.constant 0 : i32
    %c0_i32_0 = arith.constant 0 : i32
    return %arg0, %c0_i32 : i32, i32
  }
  func.func @transform_1(%arg0: i32) -> (i32, i32) {
    %c0_i32 = arith.constant 0 : i32
    %c0_i32_0 = arith.constant 0 : i32
    %c0_i32_1 = arith.constant 0 : i32
    return %c0_i32, %c0_i32_0 : i32, i32
  }
  func.func @transform_2(%arg0: i32) -> (i32, i32) {
    %c0_i32 = arith.constant 0 : i32
    %c0_i32_0 = arith.constant 0 : i32
    %c0_i32_1 = arith.constant 0 : i32
    return %c0_i32, %c0_i32_0 : i32, i32
  }
  func.func @transform_3(%arg0: i32) -> (i32, i32) {
    %c0_i32 = arith.constant 0 : i32
    %c0_i32_0 = arith.constant 0 : i32
    %c0_i32_1 = arith.constant 0 : i32
    return %c0_i32, %c0_i32_0 : i32, i32
  }
  func.func @transform_4(%arg0: i32) -> (i32, i32) {
    %c0_i32 = arith.constant 0 : i32
    %c0_i32_0 = arith.constant 0 : i32
    %c0_i32_1 = arith.constant 0 : i32
    return %c0_i32, %c0_i32_0 : i32, i32
  }
  func.func @transform_5(%arg0: i32) -> (i32, i32) {
    %c0_i32 = arith.constant 0 : i32
    %c0_i32_0 = arith.constant 0 : i32
    return %arg0, %c0_i32 : i32, i32
  }
}

</mosaic_0001>

<bundles_post_ra>
// kernel: causal_transformer_forward.6
= control target key start
LH: loop header
LB: loop body
LE: loop exit
PB: predicated region body
PF: predicated region fallthrough
CT: control target
= control target key end

     0   :  { %s792_s13 = smov 0   ;;  %s869_s0 = inlined_call_operand.vmem [shape: f32[16,32], index: 0, kind: input, shape index: {}, may-alias: {0,10}]   ;;  %s870_s1 = inlined_call_operand.vmem [shape: bf16[16,32], index: 1, kind: input, shape index: {}]   ;;  %s871_s2 = inlined_call_operand.vmem [shape: bf16[32,32], index: 2, kind: input, shape index: {}]   ;;  %s872_s3 = inlined_call_operand.vmem [shape: f32[1,32], index: 3, kind: input, shape index: {}]   ;;  %s873_s4 = inlined_call_operand.vmem [shape: f32[1,32], index: 4, kind: input, shape index: {}]   ;;  %s874_s5 = inlined_call_operand.vmem [shape: f32[1,32], index: 5, kind: input, shape index: {}]   ;;  %s875_s6 = inlined_call_operand.vmem [shape: bf16[32,64], index: 6, kind: input, shape index: {}]   ;;  %s876_s7 = inlined_call_operand.vmem [shape: f32[1,64], index: 7, kind: input, shape index: {}]   ;;  %s877_s8 = inlined_call_operand.vmem [shape: bf16[64,32], index: 8, kind: input, shape index: {}]   ;;  %s878_s9 = inlined_call_operand.vmem [shape: f32[1,32], index: 9, kind: input, shape index: {}]   ;;  %s879_s10 = inlined_call_operand.vmem [shape: f32[16,32], index: 10, kind: output, shape index: {}, may-alias: {0,10}]  }
   0x1 LB: > { %s654_s14 = sadd.s32 4294967295, %s734_s13   ;;  %p658_p0 = scmp.ge.s32.totalorder %s734_s13, 1  ;;  %s734_s13 = sphi %s792_s13, %s20_s13  }
   0x2   : > { %p320_p1 = scmp.lt.s32.totalorder %s734_s13, 3 }
   0x4   : > { %p321_p2 = pnand %p658_p0, %p320_p1 }
   0x5   : > { %p360_p3 = scmp.lt.s32.totalorder (!%p321_p2), %s654_s14, 1 }
   0x6   : > { %324 = sbr.rel (%p321_p2) target bundleno = 740 (0x2e4), region = 60 }
   0xb   : > { %v701_v0 = vld [vmem:[%s871_s2 + $0x8] sm:$0xff]  ;;  %v700_v1 = vld [vmem:[%s871_s2] sm:$0xff]  ;;  %s881_s14 = smov (!%p360_p3, %s654_s14), 1  ;;  %vm395_vm0 = vcmask 261120   ;;  %v736_v10 = vmov 32.0   ;;  %v707_v47 = vld [vmem:[%s877_s8 + $0x18] sm:$0xff] }
   0xc   : > { %405 = vmatpush.bf16.msra.mxu0 %v701_v0  ;;  %s660_s19 = sshll.u32 %s881_s14, 2  ;;  %s659_s23 = sshll.u32 %s881_s14, 3  ;;  %v717_v3 = vld [vmem:[%s872_s3] ss:$0 sm:$0xff]  ;;  %722 = vrcp.f32 %v736_v10  ;;  %v703_v22 = vld [vmem:[%s875_s6 + $0x8] sm:$0xff]  ;;  %578 = vmatpush.bf16.msra.mxu2 %v707_v47  ;;  %v706_v52 = vld [vmem:[%s877_s8 + $0x10] sm:$0xff] }
   0xd   : > { %s367_s22 = scalar_lea.vmem %s870_s1, %s660_s19  ;;  %s363_s26 = scalar_lea.vmem %s869_s0, %s659_s23  ;;  %482 = vmatpush.bf16.msra.mxu1 %v703_v22  ;;  %v702_v23 = vld [vmem:[%s875_s6] sm:$0xff]  ;;  %v705_v55 = vld [vmem:[%s877_s8 + $0x8] sm:$0xff]  ;;  %vm570_vm9 = vcmask 523264  }
   0xe   : > { %v374_v2 = vld [vmem:[%s367_s22] sm:$0xf]  ;;  %s371_s16 = scalar_lea.vmem %s879_s10, %s659_s23 }
   0xf   : > { %v373_v4 = vld [vmem:[%s363_s26] sm:$0xff] }
  0x10   : > { %406 = vmatpush.bf16.msra.mxu0 %v700_v1  ;;  %v718_v33 = vld [vmem:[%s873_s4] ss:$0 sm:$0xff]  ;;  %579 = vmatpush.bf16.msra.mxu2 %v706_v52 }
  0x11   : > { %483 = vmatpush.bf16.msra.mxu1 %v702_v23  ;;  %v719_v36 = vld [vmem:[%s874_s5] ss:$0 sm:$0xff] }
  0x12   : > { %v723_v11 = vpop.eup %722  ;;  %v720_v40 = vld [vmem:[%s876_s7] ss:$0 sm:$0xff] }
  0x13   : > { %670 = vmatmul.msk.bf16.vlgmr.msra.gmra.mxu0 %vm395_vm0, %v374_v2  ;;  %v419_v12 = vmul.f32 32.0, %v723_v11  ;;  %vm423_vm1 = vweird.f32 %v723_v11  ;;  %v704_v59 = vld [vmem:[%s877_s8] sm:$0xff] }
  0x14   : > { %580 = vmatpush.bf16.msra.mxu2 %v705_v55 }
  0x15   : > { %v420_v13 = vsub.f32 1.0, %v419_v12 }
  0x17   : > { %v421_v14 = vmul.f32 %v723_v11, %v420_v13 }
  0x18   : > { %581 = vmatpush.bf16.msra.mxu2 %v704_v59 }
  0x19   : > { %v422_v15 = vadd.f32 %v723_v11, %v421_v14 }
  0x1b   : > { %v424_v16 = vsel %vm423_vm1, %v723_v11, %v422_v15 }
  0x90   : > { %v408_v5 = vpop.f32.mrf.mxu0 }
  0x91   : > { %v409_v6 = vadd.f32 %v717_v3, %v408_v5 }
  0x93   : > { %v822_v7 = vadd.f32 %v409_v6, %v373_v4 }
  0x95   : > { %v415_v8 = vsel %vm395_vm0, %v822_v7, 0.0 }
  0x96   : > { %416 = vadd.xlane.f32.xlu0 %v415_v8 }
  0x98   : > { %v410_v9 = vpop.f32.mrf.mxu0 }
 0x109   : > { %v417_v17 = vpop.xlane.xlu0 %416 }
 0x10a   : > { %v425_v18 = vmul.f32 %v424_v16, %v417_v17 }
 0x10c   : > { %v426_v19 = vsub.f32 %v822_v7, %v425_v18 }
 0x10e   : > { %v427_v20 = vmul.f32 %v426_v19, %v426_v19 }
 0x110   : > { %v428_v21 = vsel %vm395_vm0, %v427_v20, 0.0 }
 0x111   : > { %429 = vadd.xlane.f32.xlu0 %v428_v21 }
 0x184   : > { %v430_v24 = vpop.xlane.xlu0 %429 }
 0x185   : > { %v431_v25 = vmul.f32 %v430_v24, %v424_v16 }
 0x187   : > { %v432_v26 = vadd.f32 1e-05, %v431_v25  ;;  %v721_v25 = vld [vmem:[%s878_s9] ss:$0 sm:$0xff] }
 0x189   : > { %724 = vrsqrt.f32 %v432_v26  ;;  %vm439_vm3 = vweird.f32 %v432_v26 }
 0x18f   : > { %v725_v27 = vpop.eup %724 }
 0x190   : > { %v434_v28 = vmul.f32 %v725_v27, %v432_v26  ;;  %vm440_vm2 = vweird.f32 %v725_v27 }
 0x191   : > { %vm441_vm4 = vmor %vm439_vm3, %vm440_vm2 }
 0x192   : > { %v435_v29 = vmul.f32 %v725_v27, %v434_v28 }
 0x194   : > { %v436_v30 = vmul.f32 0.5, %v435_v29 }
 0x196   : > { %v437_v31 = vsub.f32 1.5, %v436_v30 }
 0x198   : > { %v438_v32 = vmul.f32 %v725_v27, %v437_v31 }
 0x19a   : > { %v442_v34 = vsel %vm441_vm4, %v725_v27, %v438_v32 }
 0x19b   : > { %v443_v35 = vmul.f32 %v442_v34, %v426_v19 }
 0x19d   : > { %v447_v37 = vmul.f32 %v718_v33, %v443_v35 }
 0x19f   : > { %v451_v38 = vadd.f32 %v719_v36, %v447_v37 }
 0x1a1   : > { %v452_v39 = vpack.c.bf16 %v451_v38, %v451_v38 }
 0x1a3   : > { %679 = vmatmul.msk.bf16.vlgmr.msra.gmra.mxu1 %vm395_vm0, %v452_v39 }
 0x220   : > { %v485_v41 = vpop.f32.mrf.mxu1 }
 0x221   : > { %v486_v42 = vadd.f32 %v720_v40, %v485_v41 }
 0x223   : > { %v490_v43 = vmul.f32 0.70710677, %v486_v42  ;;  %v489_v21 = vmul.f32 0.5, %v486_v42 }
 0x225   : > { %v491_v44 = vmul.f32 %v490_v43, %v490_v43 }
 0x227   : > { %v492_v45 = vmin.f32 %v491_v44, 16.0 }
 0x228   : > { %v487_v46 = vpop.f32.mrf.mxu1 }
 0x229   : > { %v493_v48 = vmul.f32 2.1237322e-06, %v492_v45  ;;  %v504_v49 = vmul.f32 3.8918573e-05, %v492_v45 }
 0x22b   : > { %v494_v50 = vadd.f32 0.00028619796, %v493_v48  ;;  %v505_v51 = vadd.f32 0.001143296, %v504_v49 }
 0x22d   : > { %v495_v53 = vmul.f32 %v494_v50, %v492_v45  ;;  %v506_v54 = vmul.f32 %v505_v51, %v492_v45 }
 0x22f   : > { %v507_v56 = vadd.f32 0.014752088, %v506_v54  ;;  %v496_v57 = vadd.f32 0.0036580483, %v495_v53 }
 0x231   : > { %v508_v58 = vmul.f32 %v507_v56, %v492_v45  ;;  %v497_v61 = vmul.f32 %v496_v57, %v492_v45 }
 0x233   : > { %v509_v60 = vadd.f32 0.112945676, %v508_v58  ;;  %v498_v0 = vadd.f32 0.05243302, %v497_v61 }
 0x235   : > { %v510_v62 = vmul.f32 %v509_v60, %v492_v45  ;;  %v499_v3 = vmul.f32 %v498_v0, %v492_v45 }
 0x237   : > { %v511_v63 = vadd.f32 0.4994258, %v510_v62  ;;  %v500_v4 = vadd.f32 0.18741608, %v499_v3 }
 0x239   : > { %v512_v1 = vmul.f32 %v511_v63, %v492_v45  ;;  %v501_v6 = vmul.f32 %v500_v4, %v492_v45 }
 0x23b   : > { %v513_v2 = vadd.f32 1.0, %v512_v1  ;;  %v502_v11 = vadd.f32 1.1283791, %v501_v6 }
 0x23d   : > { %726 = vrcp.f32 %v513_v2  ;;  %v525_v10 = vand.u32 2147483648, %v513_v2  ;;  %v523_v13 = vand.u32 2147483647, %v513_v2  ;;  %vm519_vm6 = vweird.f32 %v513_v2 }
 0x23e   : > { %v503_v16 = vmul.f32 %v502_v11, %v490_v43 }
 0x23f   : > { %v526_v15 = vor.u32 1.1754944e-38, %v525_v10  ;;  %vm524_vm8 = vcmp.eq.f32.partialorder %v523_v13, 8.507059e+37 }
 0x243   : > { %v727_v5 = vpop.eup %726 }
 0x244   : > { %v515_v8 = vmul.f32 %v727_v5, %v513_v2  ;;  %vm520_vm5 = vweird.f32 %v727_v5 }
 0x245   : > { %vm521_vm7 = vmor %vm519_vm6, %vm520_vm5 }
 0x246   : > { %v516_v9 = vsub.f32 1.0, %v515_v8 }
 0x248   : > { %v517_v12 = vmul.f32 %v727_v5, %v516_v9 }
 0x24a   : > { %v518_v14 = vadd.f32 %v727_v5, %v517_v12 }
 0x24c   : > { %v522_v17 = vsel %vm521_vm7, %v727_v5, %v518_v14 }
 0x24d   : > { %v527_v18 = vsel %vm524_vm8, %v526_v15, %v522_v17 }
 0x24e   : > { %v528_v19 = vmul.f32 %v527_v18, %v503_v16 }
 0x250   : > { %v680_v20 = vclamps-f32 %v528_v19, 1.0 }
 0x252   : > { %v531_v22 = vadd.f32 1.0, %v680_v20 }
 0x254   : > { %v532_v23 = vmul.f32 %v531_v22, %v489_v21 }
 0x256   : > { %v533_v24 = vpack.c.bf16 %v532_v23, %v532_v23 }
 0x258   : > { %697 = vmatmul.msk.bf16.vlgmr.msra.gmra.mxu2 %vm570_vm9, %v533_v24 }
 0x2db   : > { %v583_v26 = vpop.f32.mrf.mxu2 }
 0x2dc   : > { %v584_v27 = vadd.f32 %v721_v25, %v583_v26 }
 0x2de   : > { %v587_v28 = vadd.f32 %v584_v27, %v822_v7 }
 0x2e0   : > { %588 = vst.msk [vmem:[%s371_s16] sm:$0xff] %vm395_vm0, %v587_v28 }
 0x2e3   : > { %v585_v29 = vpop.f32.mrf.mxu2 }
 0x2e4 PF: > { %s20_s13 = sadd.s32 1, %s734_s13  }
 0x2e5   : > { %p17_p4 = scmp.ge.s32.totalorder %s20_s13, 4  }
 0x2e7   :  { %19 = sbr.rel (!%p17_p4) target bundleno = 1 (0x1), region = 93 }

// kernel: causal_transformer_forward.9
= control target key start
LH: loop header
LB: loop body
LE: loop exit
PB: predicated region body
PF: predicated region fallthrough
CT: control target
= control target key end

     0   :  { %s428_s18 = smov 0   ;;  %s470_s0 = inlined_call_operand.vmem [shape: f32[16,32], index: 0, kind: input, shape index: {}]   ;;  %s471_s1 = inlined_call_operand.vmem [shape: f32[1,32], index: 1, kind: input, shape index: {}]   ;;  %s472_s2 = inlined_call_operand.vmem [shape: f32[1,32], index: 2, kind: input, shape index: {}]   ;;  %s473_s3 = inlined_call_operand.vmem [shape: bf16[32,128], index: 3, kind: input, shape index: {}]   ;;  %s474_s4 = inlined_call_operand.vmem [shape: f32[1,128], index: 4, kind: input, shape index: {}]   ;;  %s475_s5 = inlined_call_operand.vmem [shape: f32[16,128], index: 5, kind: output, shape index: {}]  }
   0x1 LB: > { %s353_s19 = sadd.s32 4294967295, %s395_s18   ;;  %p357_p0 = scmp.ge.s32.totalorder %s395_s18, 1  ;;  %s395_s18 = sphi %s428_s18, %s15_s18  }
   0x2   : > { %p186_p1 = scmp.lt.s32.totalorder %s395_s18, 3 }
   0x4   : > { %p187_p2 = pnand %p357_p0, %p186_p1 }
   0x5   : > { %p212_p3 = scmp.lt.s32.totalorder (!%p187_p2), %s353_s19, 1 }
   0x6   : > { %190 = sbr.rel (%p187_p2) target bundleno = 419 (0x1a3), region = 40 }
   0xb   : > { %s477_s19 = smov (!%p212_p3, %s353_s19), 1  ;;  %vm224_vm0 = vcmask 261120   ;;  %v397_v2 = vmov 32.0   ;;  %v372_v14 = vld [vmem:[%s473_s3 + $0x8] sm:$0xff]  ;;  %v371_v15 = vld [vmem:[%s473_s3] sm:$0xff] }
   0xc   : > { %s358_s20 = sshll.u32 %s477_s19, 3  ;;  %385 = vrcp.f32 %v397_v2  ;;  %292 = vmatpush.bf16.msra.mxu0 %v372_v14  ;;  %v382_v25 = vld [vmem:[%s471_s1] ss:$0 sm:$0xff] }
   0xd   : > { %s215_s23 = scalar_lea.vmem %s470_s0, %s358_s20  ;;  %v383_v28 = vld [vmem:[%s472_s2] ss:$0 sm:$0xff]  ;;  %s219_s11 = scalar_lea.vmem %s475_s5, %s358_s20 }
   0xe   : > { %v221_v0 = vld [vmem:[%s215_s23] sm:$0xff] }
   0xf   : > { %v225_v1 = vsel %vm224_vm0, %v221_v0, 0.0  ;;  %v384_v32 = vld [vmem:[%s474_s4] ss:$0 sm:$0xff] }
  0x10   : > { %226 = vadd.xlane.f32.xlu0 %v225_v1  ;;  %293 = vmatpush.bf16.msra.mxu0 %v371_v15 }
  0x12   : > { %v386_v3 = vpop.eup %385 }
  0x13   : > { %v229_v4 = vmul.f32 32.0, %v386_v3  ;;  %vm233_vm1 = vweird.f32 %v386_v3 }
  0x15   : > { %v230_v5 = vsub.f32 1.0, %v229_v4 }
  0x17   : > { %v231_v6 = vmul.f32 %v386_v3, %v230_v5 }
  0x19   : > { %v232_v7 = vadd.f32 %v386_v3, %v231_v6 }
  0x1b   : > { %v234_v8 = vsel %vm233_vm1, %v386_v3, %v232_v7 }
  0x83   : > { %v227_v9 = vpop.xlane.xlu0 %226 }
  0x84   : > { %v235_v10 = vmul.f32 %v234_v8, %v227_v9 }
  0x86   : > { %v236_v11 = vsub.f32 %v221_v0, %v235_v10 }
  0x88   : > { %v237_v12 = vmul.f32 %v236_v11, %v236_v11 }
  0x8a   : > { %v238_v13 = vsel %vm224_vm0, %v237_v12, 0.0 }
  0x8b   : > { %239 = vadd.xlane.f32.xlu0 %v238_v13 }
  0xfe   : > { %v240_v16 = vpop.xlane.xlu0 %239 }
  0xff   : > { %v241_v17 = vmul.f32 %v240_v16, %v234_v8 }
 0x101   : > { %v242_v18 = vadd.f32 1e-05, %v241_v17 }
 0x103   : > { %387 = vrsqrt.f32 %v242_v18  ;;  %vm249_vm3 = vweird.f32 %v242_v18 }
 0x109   : > { %v388_v19 = vpop.eup %387 }
 0x10a   : > { %v244_v20 = vmul.f32 %v388_v19, %v242_v18  ;;  %vm250_vm2 = vweird.f32 %v388_v19 }
 0x10b   : > { %vm251_vm4 = vmor %vm249_vm3, %vm250_vm2 }
 0x10c   : > { %v245_v21 = vmul.f32 %v388_v19, %v244_v20 }
 0x10e   : > { %v246_v22 = vmul.f32 0.5, %v245_v21 }
 0x110   : > { %v247_v23 = vsub.f32 1.5, %v246_v22 }
 0x112   : > { %v248_v24 = vmul.f32 %v388_v19, %v247_v23 }
 0x114   : > { %v252_v26 = vsel %vm251_vm4, %v388_v19, %v248_v24 }
 0x115   : > { %v253_v27 = vmul.f32 %v252_v26, %v236_v11 }
 0x117   : > { %v257_v29 = vmul.f32 %v382_v25, %v253_v27 }
 0x119   : > { %v261_v30 = vadd.f32 %v383_v28, %v257_v29 }
 0x11b   : > { %v262_v31 = vpack.c.bf16 %v261_v30, %v261_v30 }
 0x11d   : > { %368 = vmatmul.msk.bf16.vlgmr.msra.gmra.mxu0 %vm224_vm0, %v262_v31 }
 0x19a   : > { %v295_v33 = vpop.f32.mrf.mxu0 }
 0x19b   : > { %v296_v34 = vadd.f32 %v384_v32, %v295_v33 }
 0x19d   : > { %299 = vst [vmem:[%s219_s11] sm:$0xff] %v296_v34 }
 0x1a2   : > { %v297_v35 = vpop.f32.mrf.mxu0 }
 0x1a3 PF: > { %s15_s18 = sadd.s32 1, %s395_s18  }
 0x1a4   : > { %p12_p4 = scmp.ge.s32.totalorder %s15_s18, 4  }
 0x1a6   :  { %14 = sbr.rel (!%p12_p4) target bundleno = 1 (0x1), region = 70 }

// kernel: causal_transformer_forward.5
= control target key start
LH: loop header
LB: loop body
LE: loop exit
PB: predicated region body
PF: predicated region fallthrough
CT: control target
= control target key end

     0   :  { %s1133_s24 = smov 0   ;;  %s1335_s0 = inlined_call_operand.vmem [shape: f32[2,8,32], index: 0, kind: input, shape index: {}]   ;;  %s1336_s1 = inlined_call_operand.vmem [shape: f32[1,32], index: 1, kind: input, shape index: {}]   ;;  %s1337_s2 = inlined_call_operand.vmem [shape: f32[1,32], index: 2, kind: input, shape index: {}]   ;;  %s1338_s3 = inlined_call_operand.vmem [shape: bf16[32,96], index: 3, kind: input, shape index: {}]   ;;  %s1339_s4 = inlined_call_operand.vmem [shape: f32[1,96], index: 4, kind: input, shape index: {}]   ;;  %s1340_s5 = inlined_call_operand.vmem [shape: f32[8,4], index: 5, kind: input, shape index: {}]   ;;  %s1341_s6 = inlined_call_operand.vmem [shape: f32[8,4], index: 6, kind: input, shape index: {}]   ;;  %s1342_s7 = inlined_call_operand.vmem [shape: bf16[2,8,32], index: 7, kind: output, shape index: {}]  }
   0x1 LB: > { %s941_s25 = sadd.s32 4294967295, %s1066_s24   ;;  %p945_p0 = scmp.ge.s32.totalorder %s1066_s24, 1  ;;  %s1066_s24 = sphi %s1133_s24, %s17_s24  }
   0x2   : > { %p236_p1 = scmp.lt.s32.totalorder %s1066_s24, 3 }
   0x4   : > { %p237_p2 = pnand %p945_p0, %p236_p1 }
   0x5   : > { %p266_p3 = scmp.lt.s32.totalorder (!%p237_p2), %s941_s25, 1  ;;  %s1069_s9 = smov (!%p237_p2), 36  }
   0x6   : > { %240 = sbr.rel (%p237_p2) target bundleno = 1365 (0x555), region = 48  ;;  %s1070_s10 = smov (!%p237_p2), 44  }
   0x7   : > { %s1071_s11 = smov (!%p237_p2), 32   ;;  %s1072_s12 = smov (!%p237_p2), 40  }
   0x8   : > { %s1073_s13 = smov (!%p237_p2), 8   ;;  %s1074_s14 = smov (!%p237_p2), 60  }
   0x9   : > { %s1075_s15 = smov (!%p237_p2), 56   ;;  %s1076_s16 = smov (!%p237_p2), 28  }
   0xa   : > { %s1077_s17 = smov (!%p237_p2), 24   ;;  %s1078_s18 = smov (!%p237_p2), 52  }
   0xb   : > { %s1344_s25 = smov (!%p266_p3, %s941_s25), 1  ;;  %vm278_vm0 = vcmask 261120   ;;  %v1068_v2 = vmov 32.0   ;;  %v1151_v3 = vld [vmem:[%s1341_s6] sm:$0xff]  ;;  %s1079_s19 = smov 12   ;;  %v968_v16 = vld [vmem:[%s1338_s3 + $0x8] sm:$0xff] }
   0xc   : > { %s946_s26 = sshll.u32 %s1344_s25, 3  ;;  %1040 = vrcp.f32 %v1068_v2  ;;  %388 = vrot.lane.b32.xlu1 %v1151_v3, %s1069_s9  ;;  %519 = vrot.lane.b32.xlu2 %v1151_v3, %s1070_s10  ;;  %s1080_s20 = smov 48   ;;  %v1181_v15 = vld [vmem:[%s1340_s5] sm:$0xff]  ;;  %vm382_vm5 = vcmask 31744   ;;  %vm421_vm6 = vcmask 64512   ;;  %vm462_vm8 = vcmask 1043456  }
   0xd   : > { %s269_s29 = scalar_lea.vmem %s1335_s0, %s946_s26  ;;  %s1081_s21 = smov 16   ;;  %346 = vmatpush.bf16.msra.mxu0 %v968_v16  ;;  %v967_v17 = vld [vmem:[%s1338_s3] sm:$0xff]  ;;  %vm879_vm9 = vcmask 130048   ;;  %vm882_vm10 = vcmask 195584   ;;  %vm886_vm11 = vcmask 257024  }
   0xe   : > { %v275_v0 = vld [vmem:[%s269_s29] sm:$0xff]  ;;  %s1082_s26 = smov 4   ;;  %s1083_s27 = smov 20  }
   0xf   : > { %v279_v1 = vsel %vm278_vm0, %v275_v0, 0.0  ;;  %v1037_v27 = vld [vmem:[%s1336_s1] ss:$0 sm:$0xff]  ;;  %s1085_s22 = smov 96   ;;  %s1086_s23 = smov 88  }
  0x10   : > { %280 = vadd.xlane.f32.xlu0 %v279_v1  ;;  %v1038_v30 = vld [vmem:[%s1337_s2] ss:$0 sm:$0xff]  ;;  %s1089_s28 = smov 104   ;;  %s1090_s29 = smov 80  }
  0x11   : > { %347 = vmatpush.bf16.msra.mxu0 %v967_v17  ;;  %v1039_v39 = vld [vmem:[%s1339_s4] ss:$0 sm:$0xff]  ;;  %s1091_s30 = smov 112   ;;  %s1092_s8 = smov 64  }
  0x12   : > { %v1041_v4 = vpop.eup %1040 }
  0x13   : > { %v283_v5 = vmul.f32 32.0, %v1041_v4  ;;  %vm287_vm1 = vweird.f32 %v1041_v4 }
  0x14   : > { %401 = vrot.lane.b32.xlu1 %v1151_v3, %s1071_s11  ;;  %532 = vrot.lane.b32.xlu2 %v1151_v3, %s1072_s12 }
  0x15   : > { %v284_v6 = vsub.f32 1.0, %v283_v5 }
  0x17   : > { %v285_v7 = vmul.f32 %v1041_v4, %v284_v6 }
  0x19   : > { %v286_v8 = vadd.f32 %v1041_v4, %v285_v7 }
  0x1b   : > { %v288_v9 = vsel %vm287_vm1, %v1041_v4, %v286_v8 }
  0x1c   : > { %497 = vrot.lane.b32.xlu1 %v1151_v3, %s1073_s13  ;;  %773 = vrot.lane.b32.xlu2 %v1151_v3, %s1074_s14 }
  0x24   : > { %786 = vrot.lane.b32.xlu1 %v1151_v3, %s1075_s15  ;;  %738 = vrot.lane.b32.xlu2 %v1151_v3, %s1076_s16 }
  0x2c   : > { %751 = vrot.lane.b32.xlu1 %v1151_v3, %s1077_s17  ;;  %646 = vrot.lane.b32.xlu2 %v1151_v3, %s1078_s18 }
  0x34   : > { %384 = vrot.lane.b32.xlu1 %v1181_v15, %s1071_s11  ;;  %397 = vrot.lane.b32.xlu2 %v1181_v15, %s1069_s9 }
  0x3c   : > { %362 = vrot.lane.b32.xlu1 %v1151_v3, %s1082_s26  ;;  %611 = vrot.lane.b32.xlu2 %v1151_v3, %s1083_s27 }
  0x44   : > { %493 = vrot.lane.b32.xlu1 %v1181_v15, %s1079_s19  ;;  %515 = vrot.lane.b32.xlu2 %v1181_v15, %s1072_s12 }
  0x4c   : > { %769 = vrot.lane.b32.xlu1 %v1181_v15, %s1075_s15  ;;  %782 = vrot.lane.b32.xlu2 %v1181_v15, %s1074_s14 }
  0x54   : > { %655 = vrot.lane.b32.xlu1 %v1181_v15, %s1078_s18  ;;  %734 = vrot.lane.b32.xlu2 %v1181_v15, %s1077_s17 }
  0x5c   : > { %607 = vrot.lane.b32.xlu2 %v1181_v15, %s1081_s21 }
  0x66   : > { %v520_v34 = vpop.permute.xlu2 %519 }
  0x6e   : > { %v533_v36 = vpop.permute.xlu2 %532 }
  0x76   : > { %v774_v38 = vpop.permute.xlu2 %773 }
  0x7e   : > { %v389_v35 = vpop.permute.xlu1 %388  ;;  %v739_v46 = vpop.permute.xlu2 %738 }
  0x83   : > { %v281_v10 = vpop.xlane.xlu0 %280 }
  0x84   : > { %v289_v11 = vmul.f32 %v288_v9, %v281_v10 }
  0x86   : > { %v290_v12 = vsub.f32 %v275_v0, %v289_v11  ;;  %v402_v37 = vpop.permute.xlu1 %401  ;;  %v647_v52 = vpop.permute.xlu2 %646 }
  0x88   : > { %v291_v13 = vmul.f32 %v290_v12, %v290_v12 }
  0x8a   : > { %v292_v14 = vsel %vm278_vm0, %v291_v13, 0.0 }
  0x8b   : > { %293 = vadd.xlane.f32.xlu0 %v292_v14 }
  0x8e   : > { %v498_v41 = vpop.permute.xlu1 %497  ;;  %v398_v56 = vpop.permute.xlu2 %397 }
  0x96   : > { %v787_v48 = vpop.permute.xlu1 %786  ;;  %v612_v61 = vpop.permute.xlu2 %611 }
  0x9e   : > { %v752_v54 = vpop.permute.xlu1 %751  ;;  %v516_v7 = vpop.permute.xlu2 %515 }
  0x9f   : > { %484 = vrot.lane.b32.xlu0 %v1151_v3, %s1079_s19  ;;  %s1084_s19 = smov 124  }
  0xa6   : > { %v385_v5 = vpop.permute.xlu1 %384  ;;  %v783_v10 = vpop.permute.xlu2 %782 }
  0xa7   : > { %659 = vrot.lane.b32.xlu0 %v1151_v3, %s1080_s20 }
  0xae   : > { %v363_v6 = vpop.permute.xlu1 %362  ;;  %v735_v13 = vpop.permute.xlu2 %734 }
  0xaf   : > { %624 = vrot.lane.b32.xlu0 %v1151_v3, %s1081_s21 }
  0xb6   : > { %v608_v17 = vpop.permute.xlu2 %607 }
  0xb7   : > { %528 = vrot.lane.b32.xlu0 %v1181_v15, %s1070_s10 }
  0xbf   : > { %480 = vrot.lane.b32.xlu0 %v1181_v15, %s1073_s13 }
  0xc7   : > { %747 = vrot.lane.b32.xlu0 %v1181_v15, %s1076_s16 }
  0xfe   : > { %v294_v18 = vpop.xlane.xlu0 %293 }
  0xff   : > { %v295_v19 = vmul.f32 %v294_v18, %v288_v9  ;;  %v494_v9 = vpop.permute.xlu1 %493 }
 0x101   : > { %v296_v20 = vadd.f32 1e-05, %v295_v19 }
 0x103   : > { %1042 = vrsqrt.f32 %v296_v20  ;;  %vm303_vm3 = vweird.f32 %v296_v20 }
 0x109   : > { %v1043_v21 = vpop.eup %1042 }
 0x10a   : > { %v298_v22 = vmul.f32 %v1043_v21, %v296_v20  ;;  %vm304_vm2 = vweird.f32 %v1043_v21 }
 0x10b   : > { %vm305_vm4 = vmor %vm303_vm3, %vm304_vm2 }
 0x10c   : > { %v299_v23 = vmul.f32 %v1043_v21, %v298_v22 }
 0x10e   : > { %v300_v24 = vmul.f32 0.5, %v299_v23 }
 0x110   : > { %v301_v25 = vsub.f32 1.5, %v300_v24 }
 0x111   : > { %v485_v50 = vpop.permute.xlu0 %484 }
 0x112   : > { %v302_v26 = vmul.f32 %v1043_v21, %v301_v25 }
 0x114   : > { %v306_v28 = vsel %vm305_vm4, %v1043_v21, %v302_v26 }
 0x115   : > { %v307_v29 = vmul.f32 %v306_v28, %v290_v12  ;;  %v770_v12 = vpop.permute.xlu1 %769 }
 0x117   : > { %v311_v31 = vmul.f32 %v1037_v27, %v307_v29 }
 0x119   : > { %v315_v32 = vadd.f32 %v1038_v30, %v311_v31  ;;  %v660_v63 = vpop.permute.xlu0 %659 }
 0x11b   : > { %v316_v33 = vpack.c.bf16 %v315_v32, %v315_v32 }
 0x11d   : > { %956 = vmatmul.msk.bf16.vlgmr.msra.gmra.mxu0 %vm278_vm0, %v316_v33  ;;  %v656_v16 = vpop.permute.xlu1 %655 }
 0x121   : > { %v625_v2 = vpop.permute.xlu0 %624 }
 0x129   : > { %v529_v8 = vpop.permute.xlu0 %528 }
 0x131   : > { %v481_v11 = vpop.permute.xlu0 %480 }
 0x139   : > { %v748_v14 = vpop.permute.xlu0 %747 }
 0x19a   : > { %v349_v40 = vpop.f32.mrf.mxu0 }
 0x19b   : > { %v1225_v42 = vadd.f32 %v1039_v39, %v349_v40 }
 0x19d   : > { %v391_v43 = vmul.f32 %v389_v35, %v1225_v42  ;;  %v404_v44 = vmul.f32 %v402_v37, %v1225_v42  ;;  %v535_v45 = vmul.f32 %v533_v36, %v1225_v42  ;;  %v522_v49 = vmul.f32 %v520_v34, %v1225_v42 }
 0x19e   : > { %v487_v51 = vmul.f32 %v485_v50, %v1225_v42  ;;  %v500_v53 = vmul.f32 %v498_v41, %v1225_v42  ;;  %v754_v55 = vmul.f32 %v752_v54, %v1225_v42  ;;  %v776_v57 = vmul.f32 %v774_v38, %v1225_v42 }
 0x19f   : > { %393 = vrot.lane.b32.xlu0 %v391_v43, %s1084_s19  ;;  %406 = vrot.lane.b32.xlu1 %v404_v44, %s1082_s26  ;;  %v789_v58 = vmul.f32 %v787_v48, %v1225_v42  ;;  %v649_v59 = vmul.f32 %v647_v52, %v1225_v42  ;;  %v741_v60 = vmul.f32 %v739_v46, %v1225_v42 }
 0x1a0   : > { %537 = vrot.lane.b32.xlu2 %v535_v45, %s1082_s26  ;;  %v614_v62 = vmul.f32 %v612_v61, %v1225_v42  ;;  %v662_v0 = vmul.f32 %v660_v63, %v1225_v42  ;;  %v376_v1 = vmul.f32 %v1151_v3, %v1225_v42  ;;  %v627_v4 = vmul.f32 %v625_v2, %v1225_v42 }
 0x1a1   : > { %v387_v3 = vmul.f32 %v385_v5, %v1225_v42  ;;  %v400_v18 = vmul.f32 %v398_v56, %v1225_v42  ;;  %v518_v25 = vmul.f32 %v516_v7, %v1225_v42  ;;  %v531_v26 = vmul.f32 %v529_v8, %v1225_v42 }
 0x1a2   : > { %v351_v47 = vpop.f32.mrf.mxu0  ;;  %v365_v31 = vmul.f32 %v363_v6, %v1225_v42  ;;  %v483_v34 = vmul.f32 %v481_v11, %v1225_v42  ;;  %v496_v35 = vmul.f32 %v494_v9, %v1225_v42  ;;  %v772_v41 = vmul.f32 %v770_v12, %v1225_v42 }
 0x1a3   : > { %v785_v43 = vmul.f32 %v783_v10, %v1225_v42  ;;  %v737_v50 = vmul.f32 %v735_v13, %v1225_v42 }
 0x1a7   : > { %642 = vrot.lane.b32.xlu0 %v1181_v15, %s1080_s20  ;;  %524 = vrot.lane.b32.xlu1 %v522_v49, %s1084_s19 }
 0x1a8   : > { %489 = vrot.lane.b32.xlu2 %v487_v51, %s1084_s19  ;;  %v750_v51 = vmul.f32 %v748_v14, %v1225_v42 }
 0x1af   : > { %502 = vrot.lane.b32.xlu0 %v500_v53, %s1082_s26  ;;  %372 = vrot.lane.b32.xlu1 %v1181_v15, %s1082_s26 }
 0x1b0   : > { %756 = vrot.lane.b32.xlu2 %v754_v55, %s1082_s26 }
 0x1b7   : > { %778 = vrot.lane.b32.xlu0 %v776_v57, %s1084_s19  ;;  %791 = vrot.lane.b32.xlu1 %v789_v58, %s1082_s26 }
 0x1b8   : > { %651 = vrot.lane.b32.xlu2 %v649_v59, %s1084_s19  ;;  %v658_v59 = vmul.f32 %v656_v16, %v1225_v42 }
 0x1bf   : > { %620 = vrot.lane.b32.xlu0 %v1181_v15, %s1083_s27  ;;  %743 = vrot.lane.b32.xlu1 %v741_v60, %s1084_s19  ;;  %s1088_s27 = smov 72  }
 0x1c0   : > { %616 = vrot.lane.b32.xlu2 %v614_v62, %s1084_s19 }
 0x1c7   : > { %664 = vrot.lane.b32.xlu0 %v662_v0, %s1082_s26 }
 0x1c8   : > { %378 = vrot.lane.b32.xlu2 %v376_v1, %s1082_s26  ;;  %v610_v1 = vmul.f32 %v608_v17, %v1225_v42 }
 0x1cf   : > { %629 = vrot.lane.b32.xlu0 %v627_v4, %s1082_s26  ;;  %s1087_s26 = smov 120  }
 0x1fa   : > { %v538_v23 = vpop.permute.xlu2 %537 }
 0x1fb   : > { %v540_v29 = vadd.f32 %v538_v23, %v531_v26 }
 0x202   : > { %v490_v33 = vpop.permute.xlu2 %489 }
 0x203   : > { %v492_v37 = vsub.f32 %v483_v34, %v490_v33 }
 0x20a   : > { %v757_v47 = vpop.permute.xlu2 %756 }
 0x20b   : > { %v759_v54 = vadd.f32 %v757_v47, %v750_v51 }
 0x211   : > { %v394_v19 = vpop.permute.xlu0 %393  ;;  %v407_v20 = vpop.permute.xlu1 %406 }
 0x212   : > { %v396_v21 = vsub.f32 %v387_v3, %v394_v19  ;;  %v409_v22 = vadd.f32 %v407_v20, %v400_v18  ;;  %v652_v56 = vpop.permute.xlu2 %651  ;;  %v360_v19 = vmul.f32 %v1181_v15, %v1225_v42 }
 0x214   : > { %v1002_v24 = vpack.i.bf16 %v409_v22, %v396_v21 }
 0x216   : > { %1003 = vrot.lane.b32.xlu1 %v1002_v24, %s1085_s22 }
 0x219   : > { %v643_v27 = vpop.permute.xlu0 %642  ;;  %v525_v28 = vpop.permute.xlu1 %524 }
 0x21a   : > { %v527_v30 = vsub.f32 %v518_v25, %v525_v28  ;;  %v645_v58 = vmul.f32 %v643_v27, %v1225_v42  ;;  %v617_v0 = vpop.permute.xlu2 %616 }
 0x21b   : > { %v619_v5 = vsub.f32 %v610_v1, %v617_v0 }
 0x21c   : > { %v1007_v32 = vpack.i.bf16 %v540_v29, %v527_v30  ;;  %v654_v61 = vsub.f32 %v645_v58, %v652_v56 }
 0x21e   : > { %1008 = vrot.lane.b32.xlu0 %v1007_v32, %s1086_s23  ;;  %367 = vrot.lane.b32.xlu1 %v365_v31, %s1084_s19 }
 0x221   : > { %v503_v36 = vpop.permute.xlu0 %502  ;;  %v373_v38 = vpop.permute.xlu1 %372 }
 0x222   : > { %v505_v39 = vadd.f32 %v503_v36, %v496_v35  ;;  %v379_v8 = vpop.permute.xlu2 %378  ;;  %v375_v3 = vmul.f32 %v373_v38, %v1225_v42 }
 0x224   : > { %v1012_v40 = vpack.i.bf16 %v505_v39, %v492_v37  ;;  %v381_v23 = vadd.f32 %v379_v8, %v375_v3 }
 0x226   : > { %1013 = vrot.lane.b32.xlu1 %v1012_v40, %s1087_s26 }
 0x229   : > { %v779_v44 = vpop.permute.xlu0 %778  ;;  %v792_v45 = vpop.permute.xlu1 %791 }
 0x22a   : > { %v781_v46 = vsub.f32 %v772_v41, %v779_v44  ;;  %v794_v48 = vadd.f32 %v792_v45, %v785_v43 }
 0x22c   : > { %v1017_v49 = vpack.i.bf16 %v794_v48, %v781_v46 }
 0x22e   : > { %1018 = vrot.lane.b32.xlu2 %v1017_v49, %s1088_s27 }
 0x231   : > { %v621_v52 = vpop.permute.xlu0 %620  ;;  %v744_v53 = vpop.permute.xlu1 %743 }
 0x232   : > { %v746_v55 = vsub.f32 %v737_v50, %v744_v53  ;;  %v623_v2 = vmul.f32 %v621_v52, %v1225_v42 }
 0x234   : > { %v1022_v57 = vpack.i.bf16 %v759_v54, %v746_v55  ;;  %v355_v55 = vlaneseq }
 0x236   : > { %1023 = vrot.lane.b32.xlu0 %v1022_v57, %s1089_s28  ;;  %v356_v56 = vshrl.u32 %v355_v55, 7  ;;  %v358_v57 = vand.u32 127, %v355_v55 }
 0x238   : > { %vm359_vm7 = vcmp.le.s32.totalorder %v358_v57, %v356_v56 }
 0x239   : > { %v665_v60 = vpop.permute.xlu0 %664 }
 0x23a   : > { %v667_v62 = vadd.f32 %v665_v60, %v658_v59 }
 0x23c   : > { %v1027_v63 = vpack.i.bf16 %v667_v62, %v654_v61 }
 0x23e   : > { %1028 = vrot.lane.b32.xlu1 %v1027_v63, %s1090_s29 }
 0x241   : > { %v630_v4 = vpop.permute.xlu0 %629 }
 0x242   : > { %v632_v6 = vadd.f32 %v630_v4, %v623_v2 }
 0x244   : > { %v1032_v7 = vpack.i.bf16 %v632_v6, %v619_v5 }
 0x246   : > { %1033 = vrot.lane.b32.xlu2 %v1032_v7, %s1091_s30 }
 0x288   : > { %v1004_v9 = vpop.permute.xlu1 %1003  ;;  %v1019_v12 = vpop.permute.xlu2 %1018 }
 0x289   : > { %v1006_v10 = vunpack.i.h.bf16 %v1004_v9  ;;  %v1005_v11 = vunpack.i.l.bf16 %v1004_v9  ;;  %v1021_v14 = vunpack.i.h.bf16 %v1019_v12  ;;  %v1020_v16 = vunpack.i.l.bf16 %v1019_v12 }
 0x28a   : > { %v455_v12 = vpack.c.bf16 %v1225_v42, %v1225_v42 }
 0x28b   : > { %v418_v13 = vsel %vm382_vm5, %v1005_v11, %v1006_v10  ;;  %v803_v22 = vsel %vm382_vm5, %v1020_v16, %v1021_v14 }
 0x28c   : > { %v420_v17 = vpack.c.bf16 %v418_v13, %v418_v13  ;;  %v805_v29 = vpack.c.bf16 %v803_v22, %v803_v22 }
 0x28e   : > { %v426_v18 = vsel %vm421_vm6, %v420_v17, 0  ;;  %v810_v15 = vsel %vm421_vm6, %v805_v29, 0 }
 0x28f   : > { %435 = vmatpush.bf16.xpose.msra.mxu1 %v426_v18 }
 0x290   : > { %v368_v20 = vpop.permute.xlu1 %367  ;;  %v1009_v21 = vpop.permute.xlu0 %1008 }
 0x291   : > { %v370_v24 = vsub.f32 %v360_v19, %v368_v20  ;;  %v1011_v25 = vunpack.i.h.bf16 %v1009_v21  ;;  %v1010_v26 = vunpack.i.l.bf16 %v1009_v21 }
 0x293   : > { %v383_v27 = vsel %vm382_vm5, %v370_v24, %v381_v23  ;;  %v549_v28 = vsel %vm382_vm5, %v1010_v26, %v1011_v25 }
 0x294   : > { %v419_v30 = vpack.c.bf16 %v383_v27, %v383_v27  ;;  %v551_v31 = vpack.c.bf16 %v549_v28, %v549_v28 }
 0x296   : > { %957 = vmatmul.msk.bf16.vlgmr.msra.gmra.mxu1 %vm421_vm6, %v419_v30  ;;  %v556_v32 = vsel %vm421_vm6, %v551_v31, 0 }
 0x297   : > { %565 = vmatpush.bf16.xpose.msra.mxu3 %v556_v32 }
 0x298   : > { %v1014_v33 = vpop.permute.xlu1 %1013 }
 0x299   : > { %v1016_v34 = vunpack.i.h.bf16 %v1014_v33  ;;  %v1015_v35 = vunpack.i.l.bf16 %v1014_v33 }
 0x29b   : > { %v514_v36 = vsel %vm382_vm5, %v1015_v35, %v1016_v34 }
 0x29c   : > { %v550_v37 = vpack.c.bf16 %v514_v36, %v514_v36 }
 0x29e   : > { %959 = vmatmul.msk.bf16.vlgmr.msra.gmra.mxu3 %vm421_vm6, %v550_v37 }
 0x29f   : > { %819 = vmatpush.bf16.xpose.msrb.mxu3 %v810_v15 }
 0x2a0   : > { %v1034_v47 = vpop.permute.xlu2 %1033 }
 0x2a1   : > { %v1036_v50 = vunpack.i.h.bf16 %v1034_v47  ;;  %v1035_v51 = vunpack.i.l.bf16 %v1034_v47 }
 0x2a3   : > { %v641_v53 = vsel %vm382_vm5, %v1035_v51, %v1036_v50 }
 0x2a4   : > { %v677_v54 = vpack.c.bf16 %v641_v53, %v641_v53 }
 0x2a8   : > { %v1024_v38 = vpop.permute.xlu0 %1023 }
 0x2a9   : > { %v1026_v39 = vunpack.i.h.bf16 %v1024_v38  ;;  %v1025_v40 = vunpack.i.l.bf16 %v1024_v38 }
 0x2ab   : > { %v768_v41 = vsel %vm382_vm5, %v1025_v40, %v1026_v39 }
 0x2ac   : > { %v804_v43 = vpack.c.bf16 %v768_v41, %v768_v41 }
 0x2ae   : > { %963 = vmatmul.msk.bf16.vlgmr.msrb.gmra.mxu3 %vm421_vm6, %v804_v43 }
 0x2b0   : > { %v1029_v44 = vpop.permute.xlu1 %1028 }
 0x2b1   : > { %v1031_v45 = vunpack.i.h.bf16 %v1029_v44  ;;  %v1030_v46 = vunpack.i.l.bf16 %v1029_v44 }
 0x2b3   : > { %v676_v48 = vsel %vm382_vm5, %v1030_v46, %v1031_v45 }
 0x2b4   : > { %v678_v49 = vpack.c.bf16 %v676_v48, %v676_v48 }
 0x2b6   : > { %v683_v52 = vsel %vm421_vm6, %v678_v49, 0 }
 0x2b7   : > { %692 = vmatpush.bf16.xpose.msrb.mxu0 %v683_v52 }
 0x2be   : > { %961 = vmatmul.msk.bf16.vlgmr.msrb.gmra.mxu0 %vm421_vm6, %v677_v54 }
 0x313   : > { %v437_v58 = vpop.f32.mrf.mxu1 }
 0x314   : > { %v441_v59 = vmul.f32 0.35355338, %v437_v58 }
 0x316   : > { %v442_v60 = vsel %vm359_vm7, %v441_v59, -1e+30 }
 0x317   : > { %v443_v61 = vsel %vm421_vm6, %v442_v60, -inf }
 0x318   : > { %444 = vmax.xlane.f32.xlu0 %v443_v61 }
 0x31b   : > { %v439_v62 = vpop.f32.mrf.mxu1 }
 0x321   : > { %v567_v63 = vpop.f32.mrf.mxu3 }
 0x322   : > { %v571_v0 = vmul.f32 0.35355338, %v567_v63 }
 0x324   : > { %v572_v1 = vsel %vm359_vm7, %v571_v0, -1e+30 }
 0x325   : > { %v573_v2 = vsel %vm421_vm6, %v572_v1, -inf }
 0x326   : > { %574 = vmax.xlane.f32.xlu1 %v573_v2 }
 0x329   : > { %v569_v4 = vpop.f32.mrf.mxu3 }
 0x331   : > { %v821_v5 = vpop.f32.mrf.mxu3 }
 0x332   : > { %v825_v6 = vmul.f32 0.35355338, %v821_v5 }
 0x334   : > { %v826_v7 = vsel %vm359_vm7, %v825_v6, -1e+30 }
 0x335   : > { %v827_v8 = vsel %vm421_vm6, %v826_v7, -inf }
 0x336   : > { %828 = vmax.xlane.f32.xlu2 %v827_v8 }
 0x339   : > { %v823_v9 = vpop.f32.mrf.mxu3 }
 0x33b   : > { %v694_v10 = vpop.f32.mrf.mxu0 }
 0x33c   : > { %v698_v11 = vmul.f32 0.35355338, %v694_v10 }
 0x33e   : > { %v699_v13 = vsel %vm359_vm7, %v698_v11, -1e+30 }
 0x33f   : > { %v700_v14 = vsel %vm421_vm6, %v699_v13, -inf  ;;  %457 = vrot.lane.b32.xlu1 %v455_v12, %s1092_s8 }
 0x340   : > { %701 = vmax.xlane.f32.xlu0 %v700_v14 }
 0x343   : > { %v696_v16 = vpop.f32.mrf.mxu0 }
 0x347   : > { %839 = vrot.lane.b32.xlu1 %v455_v12, %s1072_s12  ;;  %s947_s12 = sshll.u32 %s1344_s25, 2 }
 0x38b   : > { %v445_v17 = vpop.xlane.xlu0 %444 }
 0x38c   : > { %v446_v3 = vsub.f32 %v442_v60, %v445_v17 }
 0x38e   : > { %v447_v18 = vmul.f32 1.442695, %v446_v3 }
 0x390   : > { %1044 = vpow2.f32 %v447_v18 }
 0x396   : > { %v1045_v19 = vpop.eup %1044 }
 0x397   : > { %v449_v20 = vsel %vm421_vm6, %v1045_v19, 0.0 }
 0x398   : > { %450 = vadd.xlane.f32.xlu2 %v449_v20 }
 0x399   : > { %v575_v21 = vpop.xlane.xlu1 %574 }
 0x39a   : > { %v576_v25 = vsub.f32 %v572_v1, %v575_v21 }
 0x39c   : > { %v577_v27 = vmul.f32 1.442695, %v576_v25 }
 0x3a9   : > { %v829_v28 = vpop.xlane.xlu2 %828 }
 0x3aa   : > { %v830_v30 = vsub.f32 %v826_v7, %v829_v28 }
 0x3ac   : > { %v831_v32 = vmul.f32 1.442695, %v830_v30 }
 0x3b0   : > { %585 = vrot.lane.b32.xlu2 %v455_v12, %s1075_s15 }
 0x3b1   : > { %v458_v42 = vpop.permute.xlu1 %457 }
 0x3b2   : > { %v464_v23 = vsel %vm462_vm8, %v458_v42, 0 }
 0x3b3   : > { %v702_v22 = vpop.xlane.xlu0 %701  ;;  %473 = vmatpush.bf16.msra.mxu2 %v464_v23 }
 0x3b4   : > { %v703_v24 = vsub.f32 %v699_v13, %v702_v22 }
 0x3b6   : > { %v704_v26 = vmul.f32 1.442695, %v703_v24 }
 0x3b8   : > { %1046 = vpow2.f32 %v704_v26 }
 0x3b9   : > { %1048 = vpow2.f32 %v577_v27  ;;  %v840_v40 = vpop.permute.xlu1 %839 }
 0x3ba   : > { %1050 = vpow2.f32 %v831_v32  ;;  %v845_v44 = vsel %vm462_vm8, %v840_v40, 0 }
 0x3be   : > { %v1047_v29 = vpop.eup %1046 }
 0x3bf   : > { %v706_v31 = vsel %vm421_vm6, %v1047_v29, 0.0  ;;  %v1049_v15 = vpop.eup %1048 }
 0x3c0   : > { %707 = vadd.xlane.f32.xlu0 %v706_v31  ;;  %v579_v33 = vsel %vm421_vm6, %v1049_v15, 0.0  ;;  %v1051_v34 = vpop.eup %1050 }
 0x3c1   : > { %v833_v35 = vsel %vm421_vm6, %v1051_v34, 0.0 }
 0x3c8   : > { %580 = vadd.xlane.f32.xlu0 %v579_v33 }
 0x3d0   : > { %834 = vadd.xlane.f32.xlu0 %v833_v35 }
 0x3e4   : > { %712 = vrot.lane.b32.xlu0 %v455_v12, %s1080_s20  ;;  %s273_s20 = scalar_lea.vmem %s1342_s7, %s947_s12 }
 0x40b   : > { %v451_v36 = vpop.xlane.xlu2 %450 }
 0x40c   : > { %1052 = vrcp.f32 %v451_v36 }
 0x412   : > { %v1053_v37 = vpop.eup %1052 }
 0x413   : > { %v586_v38 = vpop.permute.xlu2 %585  ;;  %v453_v39 = vmul.f32 %v1053_v37, %v1045_v19 }
 0x414   : > { %v591_v41 = vsel %vm462_vm8, %v586_v38, 0 }
 0x415   : > { %600 = vmatpush.bf16.msrb.mxu2 %v591_v41  ;;  %v454_v43 = vpack.c.bf16 %v453_v39, %v453_v39 }
 0x417   : > { %958 = vmatmul.msk.bf16.vlgmr.msra.gmra.mxu2 %vm421_vm6, %v454_v43 }
 0x419   : > { %854 = vmatpush.bf16.msra.mxu2 %v845_v44 }
 0x433   : > { %v708_v45 = vpop.xlane.xlu0 %707 }
 0x43b   : > { %v581_v46 = vpop.xlane.xlu0 %580 }
 0x43c   : > { %1054 = vrcp.f32 %v581_v46 }
 0x442   : > { %v1055_v47 = vpop.eup %1054 }
 0x443   : > { %v583_v48 = vmul.f32 %v1055_v47, %v1049_v15  ;;  %v835_v49 = vpop.xlane.xlu0 %834 }
 0x444   : > { %1056 = vrcp.f32 %v835_v49 }
 0x445   : > { %v584_v50 = vpack.c.bf16 %v583_v48, %v583_v48  ;;  %1058 = vrcp.f32 %v708_v45 }
 0x447   : > { %960 = vmatmul.msk.bf16.vlgmr.msrb.gmra.mxu2 %vm421_vm6, %v584_v50 }
 0x44a   : > { %v1057_v51 = vpop.eup %1056 }
 0x44b   : > { %v837_v52 = vmul.f32 %v1057_v51, %v1051_v34  ;;  %v1059_v53 = vpop.eup %1058 }
 0x44c   : > { %v710_v54 = vmul.f32 %v1059_v53, %v1047_v29 }
 0x44d   : > { %v838_v55 = vpack.c.bf16 %v837_v52, %v837_v52 }
 0x44e   : > { %v711_v58 = vpack.c.bf16 %v710_v54, %v710_v54 }
 0x456   : > { %v713_v56 = vpop.permute.xlu0 %712 }
 0x457   : > { %964 = vmatmul.msk.bf16.vlgmr.msra.gmra.mxu2 %vm421_vm6, %v838_v55  ;;  %v718_v57 = vsel %vm462_vm8, %v713_v56, 0 }
 0x458   : > { %727 = vmatpush.bf16.msrb.mxu1 %v718_v57 }
 0x45b   : > { %962 = vmatmul.msk.bf16.vlgmr.msrb.gmra.mxu1 %vm421_vm6, %v711_v58 }
 0x49a   : > { %v475_v59 = vpop.f32.mrf.mxu2 }
 0x49b   : > { %v479_v14 = vpack.c.bf16 %v475_v59, %v475_v59 }
 0x4a2   : > { %v477_v60 = vpop.f32.mrf.mxu2 }
 0x4ca   : > { %v602_v61 = vpop.f32.mrf.mxu2 }
 0x4cb   : > { %v606_v62 = vpack.c.bf16 %v602_v61, %v602_v61 }
 0x4cd   : > { %v862_v63 = vunpack.c.l.b16 %v606_v62 }
 0x4cf   : > { %v863_v0 = vpack.c.b16 %v862_v63, %v862_v63 }
 0x4d1   : > { %864 = vrot.lane.b32.xlu2 %v863_v0, %s1073_s13 }
 0x4d2   : > { %v604_v1 = vpop.f32.mrf.mxu2 }
 0x4d8   : > { %v729_v2 = vpop.f32.mrf.mxu1 }
 0x4d9   : > { %v733_v4 = vpack.c.bf16 %v729_v2, %v729_v2 }
 0x4da   : > { %v856_v5 = vpop.f32.mrf.mxu2 }
 0x4db   : > { %v867_v6 = vunpack.c.l.b16 %v733_v4  ;;  %v860_v7 = vpack.c.bf16 %v856_v5, %v856_v5 }
 0x4dd   : > { %v868_v8 = vpack.c.b16 %v867_v6, %v867_v6  ;;  %v872_v9 = vunpack.c.l.b16 %v860_v7 }
 0x4df   : > { %v873_v10 = vpack.c.b16 %v872_v9, %v872_v9  ;;  %869 = vrot.lane.b32.xlu1 %v868_v8, %s1081_s21 }
 0x4e0   : > { %v731_v11 = vpop.f32.mrf.mxu1 }
 0x4e1   : > { %874 = vrot.lane.b32.xlu2 %v873_v10, %s1077_s17 }
 0x4e2   : > { %v858_v12 = vpop.f32.mrf.mxu2 }
 0x52b   : > { %v865_v13 = vpop.permute.xlu2 %864 }
 0x52c   : > { %v878_v16 = vsel %vm421_vm6, %v479_v14, %v865_v13 }
 0x53b   : > { %v875_v3 = vpop.permute.xlu2 %874 }
 0x551   : > { %v870_v17 = vpop.permute.xlu1 %869 }
 0x552   : > { %v881_v18 = vsel %vm879_vm9, %v878_v16, %v870_v17 }
 0x553   : > { %v884_v19 = vsel %vm882_vm10, %v881_v18, %v875_v3 }
 0x554   : > { %887 = vst.msk [vmem:[%s273_s20] sm:$0xf] %vm886_vm11, %v884_v19 }
 0x555 PF: > { %s17_s24 = sadd.s32 1, %s1066_s24  }
 0x556   : > { %p14_p4 = scmp.ge.s32.totalorder %s17_s24, 4  }
 0x558   :  { %16 = sbr.rel (!%p14_p4) target bundleno = 1 (0x1), region = 78 }

</bundles_post_ra>
